<compile_context>
chip_gen: v7x
topology: tpu7x:2x2x1
jax: 0.10.0
libtpu: 0.0.40
codegen_flags: <defaults>
</compile_context>

<pallas_src>
import functools
import math

import jax
import jax.numpy as jnp
from jax.experimental import pallas as pl
from jax.experimental.pallas import tpu as pltpu


# --------------------------- in-kernel helpers ---------------------------

_SQRT1_2 = 0.7071067811865476


def _erf(x):
    # Abramowitz & Stegun 7.1.26 polynomial (|err| <= 1.5e-7): lets us keep
    # PyTorch's exact erf-GELU semantics with only exp/arith ops in Mosaic.
    a1, a2, a3, a4, a5 = (0.254829592, -0.284496736, 1.421413741,
                          -1.453152027, 1.061405429)
    p = 0.3275911
    ax = jnp.abs(x)
    t = 1.0 / (1.0 + p * ax)
    poly = ((((a5 * t + a4) * t + a3) * t + a2) * t + a1) * t
    y = 1.0 - poly * jnp.exp(-ax * ax)
    return jnp.where(x >= 0, y, -y)


def _gelu_exact(x):
    return 0.5 * x * (1.0 + _erf(x * _SQRT1_2))


def _layernorm(z, g, b, eps):
    mu = jnp.mean(z, axis=-1, keepdims=True)
    zc = z - mu
    var = jnp.mean(zc * zc, axis=-1, keepdims=True)
    return zc * jax.lax.rsqrt(var + eps) * g + b


# ------------------------------ fused kernel ------------------------------

def _vit_fused_kernel(patches_ref, add_ref, bias_ref, patch_w_ref,
                      qkv_w_ref, qkv_b_ref, out_w_ref, out_b_ref,
                      lin1_w_ref, lin1_b_ref, lin2_w_ref, lin2_b_ref,
                      ln1_g_ref, ln1_b_ref, ln2_g_ref, ln2_b_ref,
                      fc_w_ref, fc_b_ref, o_ref,
                      *, depth, num_heads, head_dim, batch, eps):
    E = num_heads * head_dim
    scale = 1.0 / math.sqrt(head_dim)

    # Patch embedding fused with cls-token / positional embedding: the first
    # `batch` rows of `patches` are all-zero, so after the matmul they become
    # exactly cls_token + pos[0] via the additive term; patch rows get
    # conv(x) + patch_bias + pos[1 + p].  Rows are ordered (token s major,
    # sample b minor):  row = s * batch + b.
    x = jnp.dot(patches_ref[...], patch_w_ref[...],
                preferred_element_type=jnp.float32) + add_ref[...]   # (S*B, E)

    attn_bias = bias_ref[...]            # (S*B, S*B): 0 allowed / -1e30 masked

    for d in range(depth):               # static unroll (depth is tiny)
        qkv_w = qkv_w_ref[d]
        qkv_b = qkv_b_ref[d]
        out_w = out_w_ref[d]
        out_b = out_b_ref[d]
        lin1_w = lin1_w_ref[d]
        lin1_b = lin1_b_ref[d]
        lin2_w = lin2_w_ref[d]
        lin2_b = lin2_b_ref[d]
        ln1_g = ln1_g_ref[d]
        ln1_b = ln1_b_ref[d]
        ln2_g = ln2_g_ref[d]
        ln2_b = ln2_b_ref[d]

        # ---------------- self-attention (post-norm block) ----------------
        # batch_first=False quirk: attention mixes the B samples of the SAME
        # token; with (s-major, b-minor) rows that is block-diagonal over
        # consecutive B-sized blocks -> enforce via the additive mask.
        qkv = jnp.dot(x, qkv_w, preferred_element_type=jnp.float32) + qkv_b

        attn = jnp.zeros_like(x)
        for h in range(num_heads):       # static unroll; heads sliced in VMEM
            lo = h * head_dim
            q = qkv[:, lo:lo + head_dim] * scale
            k = qkv[:, E + lo:E + lo + head_dim]
            v = qkv[:, 2 * E + lo:2 * E + lo + head_dim]
            s = jax.lax.dot_general(q, k, (((1,), (1,)), ((), ())),
                                    preferred_element_type=jnp.float32)
            s = s + attn_bias
            s = s - jnp.max(s, axis=-1, keepdims=True)
            p = jnp.exp(s)
            p = p * pl.reciprocal(jnp.sum(p, axis=-1, keepdims=True),
                                  approx=True)
            o_h = jnp.dot(p, v, preferred_element_type=jnp.float32)
            # concat-of-heads @ W_out  ==  sum_h head_h @ W_out[h-slab]
            attn = attn + jnp.dot(o_h, out_w[lo:lo + head_dim, :],
                                  preferred_element_type=jnp.float32)
        attn = attn + out_b
        # TODO(synk): dropout (p=0.1, training only) omitted — eval semantics.
        x = _layernorm(x + attn, ln1_g, ln1_b, eps)

        # ---------------- feed-forward block (GELU fused) -----------------
        hmid = _gelu_exact(
            jnp.dot(x, lin1_w, preferred_element_type=jnp.float32) + lin1_b)
        ff = jnp.dot(hmid, lin2_w, preferred_element_type=jnp.float32) + lin2_b
        x = _layernorm(x + ff, ln2_g, ln2_b, eps)

    # classification head on the cls tokens (token s=0 == first `batch` rows).
    cls = x[0:batch, :]
    o_ref[...] = (jnp.dot(cls, fc_w_ref[...],
                          preferred_element_type=jnp.float32) + fc_b_ref[...])


# ------------------------ parameters / forward pass ------------------------

def init_params(key, *, in_channels, patch, embed_dim, num_heads, depth,
                mlp_dim, num_patches, num_classes):
    del num_heads
    k_patch, k_cls, k_pos, k_fc, k_layers = jax.random.split(key, 5)
    lk = jax.random.split(k_layers, depth * 4).reshape(depth, 4, -1)

    def norm(k, shape, scale=0.02):
        return scale * jax.random.normal(k, shape, dtype=jnp.float32)

    E, M = embed_dim, mlp_dim
    return {
        # Conv2d(in_ch, E, kernel=stride=patch) == linear over flattened patch
        "patch_w": norm(k_patch, (in_channels * patch * patch, E)),
        "patch_b": jnp.zeros((E,), jnp.float32),
        "cls_token": norm(k_cls, (1, 1, E)),
        "pos_embed": norm(k_pos, (1, num_patches + 1, E)),
        "fc_w": norm(k_fc, (E, num_classes)),
        "fc_b": jnp.zeros((num_classes,), jnp.float32),
        # transformer layers, stacked on a leading depth axis
        "qkv_w": jnp.stack([norm(lk[d, 0], (E, 3 * E)) for d in range(depth)]),
        "qkv_b": jnp.zeros((depth, 1, 3 * E), jnp.float32),
        "out_w": jnp.stack([norm(lk[d, 1], (E, E)) for d in range(depth)]),
        "out_b": jnp.zeros((depth, 1, E), jnp.float32),
        "lin1_w": jnp.stack([norm(lk[d, 2], (E, M)) for d in range(depth)]),
        "lin1_b": jnp.zeros((depth, 1, M), jnp.float32),
        "lin2_w": jnp.stack([norm(lk[d, 3], (M, E)) for d in range(depth)]),
        "lin2_b": jnp.zeros((depth, 1, E), jnp.float32),
        "ln1_g": jnp.ones((depth, 1, E), jnp.float32),
        "ln1_b": jnp.zeros((depth, 1, E), jnp.float32),
        "ln2_g": jnp.ones((depth, 1, E), jnp.float32),
        "ln2_b": jnp.zeros((depth, 1, E), jnp.float32),
    }


def vit_forward(params, x, *, patch, num_heads):
    B, C, Himg, Wimg = x.shape
    Hp, Wp = Himg // patch, Wimg // patch
    Np = Hp * Wp
    S = Np + 1
    SB = S * B
    E = params["patch_w"].shape[1]
    depth = params["qkv_w"].shape[0]
    head_dim = E // num_heads
    nclass = params["fc_w"].shape[1]

    # ---- wrapper-side layout prep (tiny, fuses into one XLA fusion) -------
    # non-overlapping patch extraction, rows ordered (patch p major, sample b
    # minor); pixel order (c, kh, kw) matches Conv2d weight (E,C,P,P).reshape.
    patches = x.reshape(B, C, Hp, patch, Wp, patch)
    patches = patches.transpose(2, 4, 0, 1, 3, 5).reshape(
        Np * B, C * patch * patch)
    # prepend B zero rows: after the in-kernel matmul those rows are exactly 0
    # and the additive term below turns them into cls_token + pos[0].
    patches_ext = jnp.concatenate(
        [jnp.zeros((B, patches.shape[1]), jnp.float32), patches], axis=0)

    cls_pos = jnp.broadcast_to(
        params["cls_token"][0, 0] + params["pos_embed"][0, 0], (B, E))
    patch_pos = jnp.repeat(
        params["pos_embed"][0, 1:] + params["patch_b"][None, :], B, axis=0)
    add_term = jnp.concatenate([cls_pos, patch_pos], axis=0)      # (SB, E)

    # additive block-diagonal attention mask (same token s <=> same B-block).
    blk = jnp.arange(SB) // B
    attn_bias = jnp.where(blk[:, None] == blk[None, :],
                          0.0, -1e30).astype(jnp.float32)

    kernel = functools.partial(_vit_fused_kernel, depth=depth,
                               num_heads=num_heads, head_dim=head_dim,
                               batch=B, eps=1e-5)
    # Single fused call: whole model resident in VMEM on v5e/v6e/v7x.
    return pl.pallas_call(
        kernel,
        out_shape=jax.ShapeDtypeStruct((B, nclass), jnp.float32),
    )(patches_ext, add_term, attn_bias, params["patch_w"],
      params["qkv_w"], params["qkv_b"], params["out_w"], params["out_b"],
      params["lin1_w"], params["lin1_b"], params["lin2_w"], params["lin2_b"],
      params["ln1_g"], params["ln1_b"], params["ln2_g"], params["ln2_b"],
      params["fc_w"], params["fc_b"].reshape(1, nclass))


# ------------------------- pure-JAX reference (check) -----------------------

def _ln_ref(z, g, b, eps=1e-5):
    mu = jnp.mean(z, axis=-1, keepdims=True)
    var = jnp.mean((z - mu) ** 2, axis=-1, keepdims=True)
    return (z - mu) * jax.lax.rsqrt(var + eps) * g + b


def vit_reference(params, x, *, patch, num_heads):
    B, C, Himg, Wimg = x.shape
    Hp, Wp = Himg // patch, Wimg // patch
    E = params["patch_w"].shape[1]
    depth = params["qkv_w"].shape[0]
    dh = E // num_heads

    patches = x.reshape(B, C, Hp, patch, Wp, patch)
    patches = patches.transpose(0, 2, 4, 1, 3, 5).reshape(
        B * Hp * Wp, C * patch * patch)
    tok = (patches @ params["patch_w"] + params["patch_b"]).reshape(
        B, Hp * Wp, E)
    cls = jnp.broadcast_to(params["cls_token"], (B, 1, E))
    xs = jnp.concatenate([cls, tok], axis=1) + params["pos_embed"]   # (B,S,E)
    S = xs.shape[1]

    for d in range(depth):
        flat = xs.reshape(B * S, E)
        qkv = flat @ params["qkv_w"][d] + params["qkv_b"][d]
        q, k, v = jnp.split(qkv, 3, axis=-1)

        def heads(t):
            return t.reshape(B, S, num_heads, dh).transpose(1, 2, 0, 3)

        qh, kh, vh = heads(q), heads(k), heads(v)
        s = jnp.einsum("shbd,shcd->shbc", qh, kh) / math.sqrt(dh)
        p = jax.nn.softmax(s, axis=-1)
        o = jnp.einsum("shbc,shcd->shbd", p, vh)
        o = o.transpose(2, 0, 1, 3).reshape(B * S, E)
        attn = o @ params["out_w"][d] + params["out_b"][d]
        y = _ln_ref(flat + attn, params["ln1_g"][d], params["ln1_b"][d])
        h1 = jax.nn.gelu(y @ params["lin1_w"][d] + params["lin1_b"][d],
                         approximate=False)
        ff = h1 @ params["lin2_w"][d] + params["lin2_b"][d]
        y = _ln_ref(y + ff, params["ln2_g"][d], params["ln2_b"][d])
        xs = y.reshape(B, S, E)

    return xs[:, 0] @ params["fc_w"] + params["fc_b"]


# ----------------------------------- main -----------------------------------

if __name__ == "__main__":
    # ViTBinaryClassifier(img_size_x=32, img_size_y=32, in_channels=1,
    #                     num_classes=2, patch_size_x=16, patch_size_y=16,
    #                     embed_dim=32, num_heads=4, depth=2, mlp_dim=64)
    B, C, Himg, Wimg = 2, 1, 32, 32
    patch, E, num_heads, depth, mlp_dim, num_classes = 16, 32, 4, 2, 64, 2
    num_patches = (Himg // patch) * (Wimg // patch)

    key = jax.random.PRNGKey(0)
    kp, kx = jax.random.split(key)
    params = init_params(kp, in_channels=C, patch=patch, embed_dim=E,
                         num_heads=num_heads, depth=depth, mlp_dim=mlp_dim,
                         num_patches=num_patches, num_classes=num_classes)
    x = jax.random.normal(kx, (B, C, Himg, Wimg), dtype=jnp.float32)

    fwd = jax.jit(functools.partial(vit_forward, patch=patch,
                                    num_heads=num_heads))
    out = fwd(params, x)
    jax.block_until_ready(out)
    assert out.shape == (B, num_classes), out.shape
    assert bool(jnp.all(jnp.isfinite(out)))

    ref = vit_reference(params, x, patch=patch, num_heads=num_heads)
    assert bool(jnp.allclose(out, ref, rtol=5e-2, atol=5e-3)), (out, ref)

    print("KERNEL_OK")
</pallas_src>

<mosaic_0001>
module attributes {stable_mosaic.version = 11 : i64} {
  func.func @_vit_fused_kernel(%arg0: memref<10x256xf32, #tpu.memory_space<vmem>>, %arg1: memref<10x32xf32, #tpu.memory_space<vmem>>, %arg2: memref<10x10xf32, #tpu.memory_space<vmem>>, %arg3: memref<256x32xf32, #tpu.memory_space<vmem>>, %arg4: memref<2x32x96xf32, #tpu.memory_space<vmem>>, %arg5: memref<2x1x96xf32, #tpu.memory_space<vmem>>, %arg6: memref<2x32x32xf32, #tpu.memory_space<vmem>>, %arg7: memref<2x1x32xf32, #tpu.memory_space<vmem>>, %arg8: memref<2x32x64xf32, #tpu.memory_space<vmem>>, %arg9: memref<2x1x64xf32, #tpu.memory_space<vmem>>, %arg10: memref<2x64x32xf32, #tpu.memory_space<vmem>>, %arg11: memref<2x1x32xf32, #tpu.memory_space<vmem>>, %arg12: memref<2x1x32xf32, #tpu.memory_space<vmem>>, %arg13: memref<2x1x32xf32, #tpu.memory_space<vmem>>, %arg14: memref<2x1x32xf32, #tpu.memory_space<vmem>>, %arg15: memref<2x1x32xf32, #tpu.memory_space<vmem>>, %arg16: memref<32x2xf32, #tpu.memory_space<vmem>>, %arg17: memref<1x2xf32, #tpu.memory_space<vmem>>, %arg18: memref<2x2xf32, #tpu.memory_space<vmem>>) attributes {dimension_semantics = [], scalar_prefetch = 0 : i64, scratch_operands = 0 : i64, tpu.core_type = #tpu.core_type<tc>} {
    %c0 = arith.constant 0 : index
    %c0_0 = arith.constant 0 : index
    %0 = vector.load %arg0[%c0, %c0_0] : memref<10x256xf32, #tpu.memory_space<vmem>>, vector<10x256xf32>
    %c0_1 = arith.constant 0 : index
    %c0_2 = arith.constant 0 : index
    %1 = vector.load %arg3[%c0_1, %c0_2] : memref<256x32xf32, #tpu.memory_space<vmem>>, vector<256x32xf32>
    %cst = arith.constant dense<0.000000e+00> : vector<10x32xf32>
    %2 = tpu.matmul %0, %1, %cst {dimension_numbers = #tpu.dot_dimension_numbers<[1], [0], [0], [1], [0, 0, 1, 1], [], []>} : vector<10x256xf32>, vector<256x32xf32>, vector<10x32xf32> -> vector<10x32xf32>
    %c0_3 = arith.constant 0 : index
    %c0_4 = arith.constant 0 : index
    %3 = vector.load %arg1[%c0_3, %c0_4] : memref<10x32xf32, #tpu.memory_space<vmem>>, vector<10x32xf32>
    %4 = arith.addf %2, %3 : vector<10x32xf32>
    %c0_5 = arith.constant 0 : index
    %c0_6 = arith.constant 0 : index
    %5 = vector.load %arg2[%c0_5, %c0_6] : memref<10x10xf32, #tpu.memory_space<vmem>>, vector<10x10xf32>
    %c0_7 = arith.constant 0 : index
    %c0_8 = arith.constant 0 : index
    %c0_9 = arith.constant 0 : index
    %6 = vector.load %arg4[%c0_7, %c0_8, %c0_9] : memref<2x32x96xf32, #tpu.memory_space<vmem>>, vector<1x32x96xf32>
    %7 = vector.shape_cast %6 : vector<1x32x96xf32> to vector<32x96xf32>
    %c0_10 = arith.constant 0 : index
    %c0_11 = arith.constant 0 : index
    %c0_12 = arith.constant 0 : index
    %8 = vector.load %arg5[%c0_10, %c0_11, %c0_12] : memref<2x1x96xf32, #tpu.memory_space<vmem>>, vector<1x1x96xf32>
    %9 = vector.shape_cast %8 : vector<1x1x96xf32> to vector<1x96xf32>
    %c0_13 = arith.constant 0 : index
    %c0_14 = arith.constant 0 : index
    %c0_15 = arith.constant 0 : index
    %10 = vector.load %arg6[%c0_13, %c0_14, %c0_15] : memref<2x32x32xf32, #tpu.memory_space<vmem>>, vector<1x32x32xf32>
    %11 = vector.shape_cast %10 : vector<1x32x32xf32> to vector<32x32xf32>
    %c0_16 = arith.constant 0 : index
    %c0_17 = arith.constant 0 : index
    %c0_18 = arith.constant 0 : index
    %12 = vector.load %arg7[%c0_16, %c0_17, %c0_18] : memref<2x1x32xf32, #tpu.memory_space<vmem>>, vector<1x1x32xf32>
    %13 = vector.shape_cast %12 : vector<1x1x32xf32> to vector<1x32xf32>
    %c0_19 = arith.constant 0 : index
    %c0_20 = arith.constant 0 : index
    %c0_21 = arith.constant 0 : index
    %14 = vector.load %arg8[%c0_19, %c0_20, %c0_21] : memref<2x32x64xf32, #tpu.memory_space<vmem>>, vector<1x32x64xf32>
    %15 = vector.shape_cast %14 : vector<1x32x64xf32> to vector<32x64xf32>
    %c0_22 = arith.constant 0 : index
    %c0_23 = arith.constant 0 : index
    %c0_24 = arith.constant 0 : index
    %16 = vector.load %arg9[%c0_22, %c0_23, %c0_24] : memref<2x1x64xf32, #tpu.memory_space<vmem>>, vector<1x1x64xf32>
    %17 = vector.shape_cast %16 : vector<1x1x64xf32> to vector<1x64xf32>
    %c0_25 = arith.constant 0 : index
    %c0_26 = arith.constant 0 : index
    %c0_27 = arith.constant 0 : index
    %18 = vector.load %arg10[%c0_25, %c0_26, %c0_27] : memref<2x64x32xf32, #tpu.memory_space<vmem>>, vector<1x64x32xf32>
    %19 = vector.shape_cast %18 : vector<1x64x32xf32> to vector<64x32xf32>
    %c0_28 = arith.constant 0 : index
    %c0_29 = arith.constant 0 : index
    %c0_30 = arith.constant 0 : index
    %20 = vector.load %arg11[%c0_28, %c0_29, %c0_30] : memref<2x1x32xf32, #tpu.memory_space<vmem>>, vector<1x1x32xf32>
    %21 = vector.shape_cast %20 : vector<1x1x32xf32> to vector<1x32xf32>
    %c0_31 = arith.constant 0 : index
    %c0_32 = arith.constant 0 : index
    %c0_33 = arith.constant 0 : index
    %22 = vector.load %arg12[%c0_31, %c0_32, %c0_33] : memref<2x1x32xf32, #tpu.memory_space<vmem>>, vector<1x1x32xf32>
    %23 = vector.shape_cast %22 : vector<1x1x32xf32> to vector<1x32xf32>
    %c0_34 = arith.constant 0 : index
    %c0_35 = arith.constant 0 : index
    %c0_36 = arith.constant 0 : index
    %24 = vector.load %arg13[%c0_34, %c0_35, %c0_36] : memref<2x1x32xf32, #tpu.memory_space<vmem>>, vector<1x1x32xf32>
    %25 = vector.shape_cast %24 : vector<1x1x32xf32> to vector<1x32xf32>
    %c0_37 = arith.constant 0 : index
    %c0_38 = arith.constant 0 : index
    %c0_39 = arith.constant 0 : index
    %26 = vector.load %arg14[%c0_37, %c0_38, %c0_39] : memref<2x1x32xf32, #tpu.memory_space<vmem>>, vector<1x1x32xf32>
    %27 = vector.shape_cast %26 : vector<1x1x32xf32> to vector<1x32xf32>
    %c0_40 = arith.constant 0 : index
    %c0_41 = arith.constant 0 : index
    %c0_42 = arith.constant 0 : index
    %28 = vector.load %arg15[%c0_40, %c0_41, %c0_42] : memref<2x1x32xf32, #tpu.memory_space<vmem>>, vector<1x1x32xf32>
    %29 = vector.shape_cast %28 : vector<1x1x32xf32> to vector<1x32xf32>
    %cst_43 = arith.constant dense<0.000000e+00> : vector<10x96xf32>
    %30 = tpu.matmul %4, %7, %cst_43 {dimension_numbers = #tpu.dot_dimension_numbers<[1], [0], [0], [1], [0, 0, 1, 1], [], []>} : vector<10x32xf32>, vector<32x96xf32>, vector<10x96xf32> -> vector<10x96xf32>
    %31 = vector.broadcast %9 : vector<1x96xf32> to vector<10x96xf32>
    %32 = arith.addf %30, %31 : vector<10x96xf32>
    %cst_44 = arith.constant 0.000000e+00 : f32
    %33 = vector.broadcast %cst_44 : f32 to vector<10x32xf32>
    %34 = vector.extract_strided_slice %32 {offsets = [0, 0], sizes = [10, 8], strides = [1, 1]} : vector<10x96xf32> to vector<10x8xf32>
    %cst_45 = arith.constant 0.353553385 : f32
    %35 = vector.broadcast %cst_45 : f32 to vector<10x8xf32>
    %36 = arith.mulf %34, %35 : vector<10x8xf32>
    %37 = vector.extract_strided_slice %32 {offsets = [0, 32], sizes = [10, 8], strides = [1, 1]} : vector<10x96xf32> to vector<10x8xf32>
    %38 = vector.extract_strided_slice %32 {offsets = [0, 64], sizes = [10, 8], strides = [1, 1]} : vector<10x96xf32> to vector<10x8xf32>
    %cst_46 = arith.constant dense<0.000000e+00> : vector<10x10xf32>
    %39 = tpu.matmul %36, %37, %cst_46 {dimension_numbers = #tpu.dot_dimension_numbers<[1], [1], [0], [0], [0, 0, 1, 0], [], []>} : vector<10x8xf32>, vector<10x8xf32>, vector<10x10xf32> -> vector<10x10xf32>
    %40 = arith.addf %39, %5 : vector<10x10xf32>
    %cst_47 = arith.constant dense<0xFF800000> : vector<10xf32>
    %41 = vector.multi_reduction <maximumf>, %40, %cst_47 [1] : vector<10x10xf32> to vector<10xf32>
    %42 = vector.shape_cast %41 : vector<10xf32> to vector<10x1xf32>
    %43 = vector.broadcast %42 : vector<10x1xf32> to vector<10x10xf32>
    %44 = arith.subf %40, %43 : vector<10x10xf32>
    %45 = math.exp %44 : vector<10x10xf32>
    %cst_48 = arith.constant dense<0.000000e+00> : vector<10xf32>
    %46 = vector.multi_reduction <add>, %45, %cst_48 [1] : vector<10x10xf32> to vector<10xf32>
    %47 = vector.shape_cast %46 : vector<10xf32> to vector<10x1xf32>
    %48 = tpu.reciprocal %47 {approx = true} : vector<10x1xf32> -> vector<10x1xf32>
    %49 = vector.broadcast %48 : vector<10x1xf32> to vector<10x10xf32>
    %50 = arith.mulf %45, %49 : vector<10x10xf32>
    %cst_49 = arith.constant dense<0.000000e+00> : vector<10x8xf32>
    %51 = tpu.matmul %50, %38, %cst_49 {dimension_numbers = #tpu.dot_dimension_numbers<[1], [0], [0], [1], [0, 0, 1, 1], [], []>} : vector<10x10xf32>, vector<10x8xf32>, vector<10x8xf32> -> vector<10x8xf32>
    %52 = vector.extract_strided_slice %11 {offsets = [0, 0], sizes = [8, 32], strides = [1, 1]} : vector<32x32xf32> to vector<8x32xf32>
    %cst_50 = arith.constant dense<0.000000e+00> : vector<10x32xf32>
    %53 = tpu.matmul %51, %52, %cst_50 {dimension_numbers = #tpu.dot_dimension_numbers<[1], [0], [0], [1], [0, 0, 1, 1], [], []>} : vector<10x8xf32>, vector<8x32xf32>, vector<10x32xf32> -> vector<10x32xf32>
    %54 = arith.addf %33, %53 : vector<10x32xf32>
    %55 = vector.extract_strided_slice %32 {offsets = [0, 8], sizes = [10, 8], strides = [1, 1]} : vector<10x96xf32> to vector<10x8xf32>
    %cst_51 = arith.constant 0.353553385 : f32
    %56 = vector.broadcast %cst_51 : f32 to vector<10x8xf32>
    %57 = arith.mulf %55, %56 : vector<10x8xf32>
    %58 = vector.extract_strided_slice %32 {offsets = [0, 40], sizes = [10, 8], strides = [1, 1]} : vector<10x96xf32> to vector<10x8xf32>
    %59 = vector.extract_strided_slice %32 {offsets = [0, 72], sizes = [10, 8], strides = [1, 1]} : vector<10x96xf32> to vector<10x8xf32>
    %cst_52 = arith.constant dense<0.000000e+00> : vector<10x10xf32>
    %60 = tpu.matmul %57, %58, %cst_52 {dimension_numbers = #tpu.dot_dimension_numbers<[1], [1], [0], [0], [0, 0, 1, 0], [], []>} : vector<10x8xf32>, vector<10x8xf32>, vector<10x10xf32> -> vector<10x10xf32>
    %61 = arith.addf %60, %5 : vector<10x10xf32>
    %cst_53 = arith.constant dense<0xFF800000> : vector<10xf32>
    %62 = vector.multi_reduction <maximumf>, %61, %cst_53 [1] : vector<10x10xf32> to vector<10xf32>
    %63 = vector.shape_cast %62 : vector<10xf32> to vector<10x1xf32>
    %64 = vector.broadcast %63 : vector<10x1xf32> to vector<10x10xf32>
    %65 = arith.subf %61, %64 : vector<10x10xf32>
    %66 = math.exp %65 : vector<10x10xf32>
    %cst_54 = arith.constant dense<0.000000e+00> : vector<10xf32>
    %67 = vector.multi_reduction <add>, %66, %cst_54 [1] : vector<10x10xf32> to vector<10xf32>
    %68 = vector.shape_cast %67 : vector<10xf32> to vector<10x1xf32>
    %69 = tpu.reciprocal %68 {approx = true} : vector<10x1xf32> -> vector<10x1xf32>
    %70 = vector.broadcast %69 : vector<10x1xf32> to vector<10x10xf32>
    %71 = arith.mulf %66, %70 : vector<10x10xf32>
    %cst_55 = arith.constant dense<0.000000e+00> : vector<10x8xf32>
    %72 = tpu.matmul %71, %59, %cst_55 {dimension_numbers = #tpu.dot_dimension_numbers<[1], [0], [0], [1], [0, 0, 1, 1], [], []>} : vector<10x10xf32>, vector<10x8xf32>, vector<10x8xf32> -> vector<10x8xf32>
    %73 = vector.extract_strided_slice %11 {offsets = [8, 0], sizes = [8, 32], strides = [1, 1]} : vector<32x32xf32> to vector<8x32xf32>
    %cst_56 = arith.constant dense<0.000000e+00> : vector<10x32xf32>
    %74 = tpu.matmul %72, %73, %cst_56 {dimension_numbers = #tpu.dot_dimension_numbers<[1], [0], [0], [1], [0, 0, 1, 1], [], []>} : vector<10x8xf32>, vector<8x32xf32>, vector<10x32xf32> -> vector<10x32xf32>
    %75 = arith.addf %54, %74 : vector<10x32xf32>
    %76 = vector.extract_strided_slice %32 {offsets = [0, 16], sizes = [10, 8], strides = [1, 1]} : vector<10x96xf32> to vector<10x8xf32>
    %cst_57 = arith.constant 0.353553385 : f32
    %77 = vector.broadcast %cst_57 : f32 to vector<10x8xf32>
    %78 = arith.mulf %76, %77 : vector<10x8xf32>
    %79 = vector.extract_strided_slice %32 {offsets = [0, 48], sizes = [10, 8], strides = [1, 1]} : vector<10x96xf32> to vector<10x8xf32>
    %80 = vector.extract_strided_slice %32 {offsets = [0, 80], sizes = [10, 8], strides = [1, 1]} : vector<10x96xf32> to vector<10x8xf32>
    %cst_58 = arith.constant dense<0.000000e+00> : vector<10x10xf32>
    %81 = tpu.matmul %78, %79, %cst_58 {dimension_numbers = #tpu.dot_dimension_numbers<[1], [1], [0], [0], [0, 0, 1, 0], [], []>} : vector<10x8xf32>, vector<10x8xf32>, vector<10x10xf32> -> vector<10x10xf32>
    %82 = arith.addf %81, %5 : vector<10x10xf32>
    %cst_59 = arith.constant dense<0xFF800000> : vector<10xf32>
    %83 = vector.multi_reduction <maximumf>, %82, %cst_59 [1] : vector<10x10xf32> to vector<10xf32>
    %84 = vector.shape_cast %83 : vector<10xf32> to vector<10x1xf32>
    %85 = vector.broadcast %84 : vector<10x1xf32> to vector<10x10xf32>
    %86 = arith.subf %82, %85 : vector<10x10xf32>
    %87 = math.exp %86 : vector<10x10xf32>
    %cst_60 = arith.constant dense<0.000000e+00> : vector<10xf32>
    %88 = vector.multi_reduction <add>, %87, %cst_60 [1] : vector<10x10xf32> to vector<10xf32>
    %89 = vector.shape_cast %88 : vector<10xf32> to vector<10x1xf32>
    %90 = tpu.reciprocal %89 {approx = true} : vector<10x1xf32> -> vector<10x1xf32>
    %91 = vector.broadcast %90 : vector<10x1xf32> to vector<10x10xf32>
    %92 = arith.mulf %87, %91 : vector<10x10xf32>
    %cst_61 = arith.constant dense<0.000000e+00> : vector<10x8xf32>
    %93 = tpu.matmul %92, %80, %cst_61 {dimension_numbers = #tpu.dot_dimension_numbers<[1], [0], [0], [1], [0, 0, 1, 1], [], []>} : vector<10x10xf32>, vector<10x8xf32>, vector<10x8xf32> -> vector<10x8xf32>
    %94 = vector.extract_strided_slice %11 {offsets = [16, 0], sizes = [8, 32], strides = [1, 1]} : vector<32x32xf32> to vector<8x32xf32>
    %cst_62 = arith.constant dense<0.000000e+00> : vector<10x32xf32>
    %95 = tpu.matmul %93, %94, %cst_62 {dimension_numbers = #tpu.dot_dimension_numbers<[1], [0], [0], [1], [0, 0, 1, 1], [], []>} : vector<10x8xf32>, vector<8x32xf32>, vector<10x32xf32> -> vector<10x32xf32>
    %96 = arith.addf %75, %95 : vector<10x32xf32>
    %97 = vector.extract_strided_slice %32 {offsets = [0, 24], sizes = [10, 8], strides = [1, 1]} : vector<10x96xf32> to vector<10x8xf32>
    %cst_63 = arith.constant 0.353553385 : f32
    %98 = vector.broadcast %cst_63 : f32 to vector<10x8xf32>
    %99 = arith.mulf %97, %98 : vector<10x8xf32>
    %100 = vector.extract_strided_slice %32 {offsets = [0, 56], sizes = [10, 8], strides = [1, 1]} : vector<10x96xf32> to vector<10x8xf32>
    %101 = vector.extract_strided_slice %32 {offsets = [0, 88], sizes = [10, 8], strides = [1, 1]} : vector<10x96xf32> to vector<10x8xf32>
    %cst_64 = arith.constant dense<0.000000e+00> : vector<10x10xf32>
    %102 = tpu.matmul %99, %100, %cst_64 {dimension_numbers = #tpu.dot_dimension_numbers<[1], [1], [0], [0], [0, 0, 1, 0], [], []>} : vector<10x8xf32>, vector<10x8xf32>, vector<10x10xf32> -> vector<10x10xf32>
    %103 = arith.addf %102, %5 : vector<10x10xf32>
    %cst_65 = arith.constant dense<0xFF800000> : vector<10xf32>
    %104 = vector.multi_reduction <maximumf>, %103, %cst_65 [1] : vector<10x10xf32> to vector<10xf32>
    %105 = vector.shape_cast %104 : vector<10xf32> to vector<10x1xf32>
    %106 = vector.broadcast %105 : vector<10x1xf32> to vector<10x10xf32>
    %107 = arith.subf %103, %106 : vector<10x10xf32>
    %108 = math.exp %107 : vector<10x10xf32>
    %cst_66 = arith.constant dense<0.000000e+00> : vector<10xf32>
    %109 = vector.multi_reduction <add>, %108, %cst_66 [1] : vector<10x10xf32> to vector<10xf32>
    %110 = vector.shape_cast %109 : vector<10xf32> to vector<10x1xf32>
    %111 = tpu.reciprocal %110 {approx = true} : vector<10x1xf32> -> vector<10x1xf32>
    %112 = vector.broadcast %111 : vector<10x1xf32> to vector<10x10xf32>
    %113 = arith.mulf %108, %112 : vector<10x10xf32>
    %cst_67 = arith.constant dense<0.000000e+00> : vector<10x8xf32>
    %114 = tpu.matmul %113, %101, %cst_67 {dimension_numbers = #tpu.dot_dimension_numbers<[1], [0], [0], [1], [0, 0, 1, 1], [], []>} : vector<10x10xf32>, vector<10x8xf32>, vector<10x8xf32> -> vector<10x8xf32>
    %115 = vector.extract_strided_slice %11 {offsets = [24, 0], sizes = [8, 32], strides = [1, 1]} : vector<32x32xf32> to vector<8x32xf32>
    %cst_68 = arith.constant dense<0.000000e+00> : vector<10x32xf32>
    %116 = tpu.matmul %114, %115, %cst_68 {dimension_numbers = #tpu.dot_dimension_numbers<[1], [0], [0], [1], [0, 0, 1, 1], [], []>} : vector<10x8xf32>, vector<8x32xf32>, vector<10x32xf32> -> vector<10x32xf32>
    %117 = arith.addf %96, %116 : vector<10x32xf32>
    %118 = vector.broadcast %13 : vector<1x32xf32> to vector<10x32xf32>
    %119 = arith.addf %117, %118 : vector<10x32xf32>
    %120 = arith.addf %4, %119 : vector<10x32xf32>
    %cst_69 = arith.constant dense<0.000000e+00> : vector<10xf32>
    %121 = vector.multi_reduction <add>, %120, %cst_69 [1] : vector<10x32xf32> to vector<10xf32>
    %122 = vector.shape_cast %121 : vector<10xf32> to vector<10x1xf32>
    %cst_70 = arith.constant 3.200000e+01 : f32
    %123 = vector.broadcast %cst_70 : f32 to vector<10x1xf32>
    %124 = arith.divf %122, %123 : vector<10x1xf32>
    %125 = vector.broadcast %124 : vector<10x1xf32> to vector<10x32xf32>
    %126 = arith.subf %120, %125 : vector<10x32xf32>
    %127 = arith.mulf %126, %126 : vector<10x32xf32>
    %cst_71 = arith.constant dense<0.000000e+00> : vector<10xf32>
    %128 = vector.multi_reduction <add>, %127, %cst_71 [1] : vector<10x32xf32> to vector<10xf32>
    %129 = vector.shape_cast %128 : vector<10xf32> to vector<10x1xf32>
    %cst_72 = arith.constant 3.200000e+01 : f32
    %130 = vector.broadcast %cst_72 : f32 to vector<10x1xf32>
    %131 = arith.divf %129, %130 : vector<10x1xf32>
    %cst_73 = arith.constant 9.99999974E-6 : f32
    %132 = vector.broadcast %cst_73 : f32 to vector<10x1xf32>
    %133 = arith.addf %131, %132 : vector<10x1xf32>
    %134 = math.rsqrt %133 : vector<10x1xf32>
    %135 = vector.broadcast %134 : vector<10x1xf32> to vector<10x32xf32>
    %136 = arith.mulf %126, %135 : vector<10x32xf32>
    %137 = vector.broadcast %23 : vector<1x32xf32> to vector<10x32xf32>
    %138 = arith.mulf %136, %137 : vector<10x32xf32>
    %139 = vector.broadcast %25 : vector<1x32xf32> to vector<10x32xf32>
    %140 = arith.addf %138, %139 : vector<10x32xf32>
    %cst_74 = arith.constant dense<0.000000e+00> : vector<10x64xf32>
    %141 = tpu.matmul %140, %15, %cst_74 {dimension_numbers = #tpu.dot_dimension_numbers<[1], [0], [0], [1], [0, 0, 1, 1], [], []>} : vector<10x32xf32>, vector<32x64xf32>, vector<10x64xf32> -> vector<10x64xf32>
    %142 = vector.broadcast %17 : vector<1x64xf32> to vector<10x64xf32>
    %143 = arith.addf %141, %142 : vector<10x64xf32>
    %cst_75 = arith.constant 5.000000e-01 : f32
    %144 = vector.broadcast %cst_75 : f32 to vector<10x64xf32>
    %145 = arith.mulf %144, %143 : vector<10x64xf32>
    %cst_76 = arith.constant 0.707106769 : f32
    %146 = vector.broadcast %cst_76 : f32 to vector<10x64xf32>
    %147 = arith.mulf %143, %146 : vector<10x64xf32>
    %148 = math.absf %147 : vector<10x64xf32>
    %cst_77 = arith.constant 0.327591091 : f32
    %149 = vector.broadcast %cst_77 : f32 to vector<10x64xf32>
    %150 = arith.mulf %149, %148 : vector<10x64xf32>
    %cst_78 = arith.constant 1.000000e+00 : f32
    %151 = vector.broadcast %cst_78 : f32 to vector<10x64xf32>
    %152 = arith.addf %151, %150 : vector<10x64xf32>
    %cst_79 = arith.constant 1.000000e+00 : f32
    %153 = vector.broadcast %cst_79 : f32 to vector<10x64xf32>
    %154 = arith.divf %153, %152 : vector<10x64xf32>
    %cst_80 = arith.constant 1.06140542 : f32
    %155 = vector.broadcast %cst_80 : f32 to vector<10x64xf32>
    %156 = arith.mulf %155, %154 : vector<10x64xf32>
    %cst_81 = arith.constant -1.45315206 : f32
    %157 = vector.broadcast %cst_81 : f32 to vector<10x64xf32>
    %158 = arith.addf %156, %157 : vector<10x64xf32>
    %159 = arith.mulf %158, %154 : vector<10x64xf32>
    %cst_82 = arith.constant 1.42141378 : f32
    %160 = vector.broadcast %cst_82 : f32 to vector<10x64xf32>
    %161 = arith.addf %159, %160 : vector<10x64xf32>
    %162 = arith.mulf %161, %154 : vector<10x64xf32>
    %cst_83 = arith.constant -0.284496725 : f32
    %163 = vector.broadcast %cst_83 : f32 to vector<10x64xf32>
    %164 = arith.addf %162, %163 : vector<10x64xf32>
    %165 = arith.mulf %164, %154 : vector<10x64xf32>
    %cst_84 = arith.constant 0.254829586 : f32
    %166 = vector.broadcast %cst_84 : f32 to vector<10x64xf32>
    %167 = arith.addf %165, %166 : vector<10x64xf32>
    %168 = arith.mulf %167, %154 : vector<10x64xf32>
    %cst_85 = arith.constant 0.000000e+00 : f32
    %169 = vector.broadcast %cst_85 : f32 to vector<10x64xf32>
    %170 = arith.subf %169, %148 : vector<10x64xf32>
    %171 = arith.mulf %170, %148 : vector<10x64xf32>
    %172 = math.exp %171 : vector<10x64xf32>
    %173 = arith.mulf %168, %172 : vector<10x64xf32>
    %cst_86 = arith.constant 1.000000e+00 : f32
    %174 = vector.broadcast %cst_86 : f32 to vector<10x64xf32>
    %175 = arith.subf %174, %173 : vector<10x64xf32>
    %cst_87 = arith.constant 0.000000e+00 : f32
    %176 = vector.broadcast %cst_87 : f32 to vector<10x64xf32>
    %177 = arith.cmpf oge, %147, %176 : vector<10x64xf32>
    %cst_88 = arith.constant 0.000000e+00 : f32
    %178 = vector.broadcast %cst_88 : f32 to vector<10x64xf32>
    %179 = arith.subf %178, %175 : vector<10x64xf32>
    %180 = arith.select %177, %175, %179 : vector<10x64xi1>, vector<10x64xf32>
    %cst_89 = arith.constant 1.000000e+00 : f32
    %181 = vector.broadcast %cst_89 : f32 to vector<10x64xf32>
    %182 = arith.addf %181, %180 : vector<10x64xf32>
    %183 = arith.mulf %145, %182 : vector<10x64xf32>
    %cst_90 = arith.constant dense<0.000000e+00> : vector<10x32xf32>
    %184 = tpu.matmul %183, %19, %cst_90 {dimension_numbers = #tpu.dot_dimension_numbers<[1], [0], [0], [1], [0, 0, 1, 1], [], []>} : vector<10x64xf32>, vector<64x32xf32>, vector<10x32xf32> -> vector<10x32xf32>
    %185 = vector.broadcast %21 : vector<1x32xf32> to vector<10x32xf32>
    %186 = arith.addf %184, %185 : vector<10x32xf32>
    %187 = arith.addf %140, %186 : vector<10x32xf32>
    %cst_91 = arith.constant dense<0.000000e+00> : vector<10xf32>
    %188 = vector.multi_reduction <add>, %187, %cst_91 [1] : vector<10x32xf32> to vector<10xf32>
    %189 = vector.shape_cast %188 : vector<10xf32> to vector<10x1xf32>
    %cst_92 = arith.constant 3.200000e+01 : f32
    %190 = vector.broadcast %cst_92 : f32 to vector<10x1xf32>
    %191 = arith.divf %189, %190 : vector<10x1xf32>
    %192 = vector.broadcast %191 : vector<10x1xf32> to vector<10x32xf32>
    %193 = arith.subf %187, %192 : vector<10x32xf32>
    %194 = arith.mulf %193, %193 : vector<10x32xf32>
    %cst_93 = arith.constant dense<0.000000e+00> : vector<10xf32>
    %195 = vector.multi_reduction <add>, %194, %cst_93 [1] : vector<10x32xf32> to vector<10xf32>
    %196 = vector.shape_cast %195 : vector<10xf32> to vector<10x1xf32>
    %cst_94 = arith.constant 3.200000e+01 : f32
    %197 = vector.broadcast %cst_94 : f32 to vector<10x1xf32>
    %198 = arith.divf %196, %197 : vector<10x1xf32>
    %cst_95 = arith.constant 9.99999974E-6 : f32
    %199 = vector.broadcast %cst_95 : f32 to vector<10x1xf32>
    %200 = arith.addf %198, %199 : vector<10x1xf32>
    %201 = math.rsqrt %200 : vector<10x1xf32>
    %202 = vector.broadcast %201 : vector<10x1xf32> to vector<10x32xf32>
    %203 = arith.mulf %193, %202 : vector<10x32xf32>
    %204 = vector.broadcast %27 : vector<1x32xf32> to vector<10x32xf32>
    %205 = arith.mulf %203, %204 : vector<10x32xf32>
    %206 = vector.broadcast %29 : vector<1x32xf32> to vector<10x32xf32>
    %207 = arith.addf %205, %206 : vector<10x32xf32>
    %c1 = arith.constant 1 : index
    %c0_96 = arith.constant 0 : index
    %c0_97 = arith.constant 0 : index
    %208 = vector.load %arg4[%c1, %c0_96, %c0_97] : memref<2x32x96xf32, #tpu.memory_space<vmem>>, vector<1x32x96xf32>
    %209 = vector.shape_cast %208 : vector<1x32x96xf32> to vector<32x96xf32>
    %c1_98 = arith.constant 1 : index
    %c0_99 = arith.constant 0 : index
    %c0_100 = arith.constant 0 : index
    %210 = vector.load %arg5[%c1_98, %c0_99, %c0_100] : memref<2x1x96xf32, #tpu.memory_space<vmem>>, vector<1x1x96xf32>
    %211 = vector.shape_cast %210 : vector<1x1x96xf32> to vector<1x96xf32>
    %c1_101 = arith.constant 1 : index
    %c0_102 = arith.constant 0 : index
    %c0_103 = arith.constant 0 : index
    %212 = vector.load %arg6[%c1_101, %c0_102, %c0_103] : memref<2x32x32xf32, #tpu.memory_space<vmem>>, vector<1x32x32xf32>
    %213 = vector.shape_cast %212 : vector<1x32x32xf32> to vector<32x32xf32>
    %c1_104 = arith.constant 1 : index
    %c0_105 = arith.constant 0 : index
    %c0_106 = arith.constant 0 : index
    %214 = vector.load %arg7[%c1_104, %c0_105, %c0_106] : memref<2x1x32xf32, #tpu.memory_space<vmem>>, vector<1x1x32xf32>
    %215 = vector.shape_cast %214 : vector<1x1x32xf32> to vector<1x32xf32>
    %c1_107 = arith.constant 1 : index
    %c0_108 = arith.constant 0 : index
    %c0_109 = arith.constant 0 : index
    %216 = vector.load %arg8[%c1_107, %c0_108, %c0_109] : memref<2x32x64xf32, #tpu.memory_space<vmem>>, vector<1x32x64xf32>
    %217 = vector.shape_cast %216 : vector<1x32x64xf32> to vector<32x64xf32>
    %c1_110 = arith.constant 1 : index
    %c0_111 = arith.constant 0 : index
    %c0_112 = arith.constant 0 : index
    %218 = vector.load %arg9[%c1_110, %c0_111, %c0_112] : memref<2x1x64xf32, #tpu.memory_space<vmem>>, vector<1x1x64xf32>
    %219 = vector.shape_cast %218 : vector<1x1x64xf32> to vector<1x64xf32>
    %c1_113 = arith.constant 1 : index
    %c0_114 = arith.constant 0 : index
    %c0_115 = arith.constant 0 : index
    %220 = vector.load %arg10[%c1_113, %c0_114, %c0_115] : memref<2x64x32xf32, #tpu.memory_space<vmem>>, vector<1x64x32xf32>
    %221 = vector.shape_cast %220 : vector<1x64x32xf32> to vector<64x32xf32>
    %c1_116 = arith.constant 1 : index
    %c0_117 = arith.constant 0 : index
    %c0_118 = arith.constant 0 : index
    %222 = vector.load %arg11[%c1_116, %c0_117, %c0_118] : memref<2x1x32xf32, #tpu.memory_space<vmem>>, vector<1x1x32xf32>
    %223 = vector.shape_cast %222 : vector<1x1x32xf32> to vector<1x32xf32>
    %c1_119 = arith.constant 1 : index
    %c0_120 = arith.constant 0 : index
    %c0_121 = arith.constant 0 : index
    %224 = vector.load %arg12[%c1_119, %c0_120, %c0_121] : memref<2x1x32xf32, #tpu.memory_space<vmem>>, vector<1x1x32xf32>
    %225 = vector.shape_cast %224 : vector<1x1x32xf32> to vector<1x32xf32>
    %c1_122 = arith.constant 1 : index
    %c0_123 = arith.constant 0 : index
    %c0_124 = arith.constant 0 : index
    %226 = vector.load %arg13[%c1_122, %c0_123, %c0_124] : memref<2x1x32xf32, #tpu.memory_space<vmem>>, vector<1x1x32xf32>
    %227 = vector.shape_cast %226 : vector<1x1x32xf32> to vector<1x32xf32>
    %c1_125 = arith.constant 1 : index
    %c0_126 = arith.constant 0 : index
    %c0_127 = arith.constant 0 : index
    %228 = vector.load %arg14[%c1_125, %c0_126, %c0_127] : memref<2x1x32xf32, #tpu.memory_space<vmem>>, vector<1x1x32xf32>
    %229 = vector.shape_cast %228 : vector<1x1x32xf32> to vector<1x32xf32>
    %c1_128 = arith.constant 1 : index
    %c0_129 = arith.constant 0 : index
    %c0_130 = arith.constant 0 : index
    %230 = vector.load %arg15[%c1_128, %c0_129, %c0_130] : memref<2x1x32xf32, #tpu.memory_space<vmem>>, vector<1x1x32xf32>
    %231 = vector.shape_cast %230 : vector<1x1x32xf32> to vector<1x32xf32>
    %cst_131 = arith.constant dense<0.000000e+00> : vector<10x96xf32>
    %232 = tpu.matmul %207, %209, %cst_131 {dimension_numbers = #tpu.dot_dimension_numbers<[1], [0], [0], [1], [0, 0, 1, 1], [], []>} : vector<10x32xf32>, vector<32x96xf32>, vector<10x96xf32> -> vector<10x96xf32>
    %233 = vector.broadcast %211 : vector<1x96xf32> to vector<10x96xf32>
    %234 = arith.addf %232, %233 : vector<10x96xf32>
    %cst_132 = arith.constant 0.000000e+00 : f32
    %235 = vector.broadcast %cst_132 : f32 to vector<10x32xf32>
    %236 = vector.extract_strided_slice %234 {offsets = [0, 0], sizes = [10, 8], strides = [1, 1]} : vector<10x96xf32> to vector<10x8xf32>
    %cst_133 = arith.constant 0.353553385 : f32
    %237 = vector.broadcast %cst_133 : f32 to vector<10x8xf32>
    %238 = arith.mulf %236, %237 : vector<10x8xf32>
    %239 = vector.extract_strided_slice %234 {offsets = [0, 32], sizes = [10, 8], strides = [1, 1]} : vector<10x96xf32> to vector<10x8xf32>
    %240 = vector.extract_strided_slice %234 {offsets = [0, 64], sizes = [10, 8], strides = [1, 1]} : vector<10x96xf32> to vector<10x8xf32>
    %cst_134 = arith.constant dense<0.000000e+00> : vector<10x10xf32>
    %241 = tpu.matmul %238, %239, %cst_134 {dimension_numbers = #tpu.dot_dimension_numbers<[1], [1], [0], [0], [0, 0, 1, 0], [], []>} : vector<10x8xf32>, vector<10x8xf32>, vector<10x10xf32> -> vector<10x10xf32>
    %242 = arith.addf %241, %5 : vector<10x10xf32>
    %cst_135 = arith.constant dense<0xFF800000> : vector<10xf32>
    %243 = vector.multi_reduction <maximumf>, %242, %cst_135 [1] : vector<10x10xf32> to vector<10xf32>
    %244 = vector.shape_cast %243 : vector<10xf32> to vector<10x1xf32>
    %245 = vector.broadcast %244 : vector<10x1xf32> to vector<10x10xf32>
    %246 = arith.subf %242, %245 : vector<10x10xf32>
    %247 = math.exp %246 : vector<10x10xf32>
    %cst_136 = arith.constant dense<0.000000e+00> : vector<10xf32>
    %248 = vector.multi_reduction <add>, %247, %cst_136 [1] : vector<10x10xf32> to vector<10xf32>
    %249 = vector.shape_cast %248 : vector<10xf32> to vector<10x1xf32>
    %250 = tpu.reciprocal %249 {approx = true} : vector<10x1xf32> -> vector<10x1xf32>
    %251 = vector.broadcast %250 : vector<10x1xf32> to vector<10x10xf32>
    %252 = arith.mulf %247, %251 : vector<10x10xf32>
    %cst_137 = arith.constant dense<0.000000e+00> : vector<10x8xf32>
    %253 = tpu.matmul %252, %240, %cst_137 {dimension_numbers = #tpu.dot_dimension_numbers<[1], [0], [0], [1], [0, 0, 1, 1], [], []>} : vector<10x10xf32>, vector<10x8xf32>, vector<10x8xf32> -> vector<10x8xf32>
    %254 = vector.extract_strided_slice %213 {offsets = [0, 0], sizes = [8, 32], strides = [1, 1]} : vector<32x32xf32> to vector<8x32xf32>
    %cst_138 = arith.constant dense<0.000000e+00> : vector<10x32xf32>
    %255 = tpu.matmul %253, %254, %cst_138 {dimension_numbers = #tpu.dot_dimension_numbers<[1], [0], [0], [1], [0, 0, 1, 1], [], []>} : vector<10x8xf32>, vector<8x32xf32>, vector<10x32xf32> -> vector<10x32xf32>
    %256 = arith.addf %235, %255 : vector<10x32xf32>
    %257 = vector.extract_strided_slice %234 {offsets = [0, 8], sizes = [10, 8], strides = [1, 1]} : vector<10x96xf32> to vector<10x8xf32>
    %cst_139 = arith.constant 0.353553385 : f32
    %258 = vector.broadcast %cst_139 : f32 to vector<10x8xf32>
    %259 = arith.mulf %257, %258 : vector<10x8xf32>
    %260 = vector.extract_strided_slice %234 {offsets = [0, 40], sizes = [10, 8], strides = [1, 1]} : vector<10x96xf32> to vector<10x8xf32>
    %261 = vector.extract_strided_slice %234 {offsets = [0, 72], sizes = [10, 8], strides = [1, 1]} : vector<10x96xf32> to vector<10x8xf32>
    %cst_140 = arith.constant dense<0.000000e+00> : vector<10x10xf32>
    %262 = tpu.matmul %259, %260, %cst_140 {dimension_numbers = #tpu.dot_dimension_numbers<[1], [1], [0], [0], [0, 0, 1, 0], [], []>} : vector<10x8xf32>, vector<10x8xf32>, vector<10x10xf32> -> vector<10x10xf32>
    %263 = arith.addf %262, %5 : vector<10x10xf32>
    %cst_141 = arith.constant dense<0xFF800000> : vector<10xf32>
    %264 = vector.multi_reduction <maximumf>, %263, %cst_141 [1] : vector<10x10xf32> to vector<10xf32>
    %265 = vector.shape_cast %264 : vector<10xf32> to vector<10x1xf32>
    %266 = vector.broadcast %265 : vector<10x1xf32> to vector<10x10xf32>
    %267 = arith.subf %263, %266 : vector<10x10xf32>
    %268 = math.exp %267 : vector<10x10xf32>
    %cst_142 = arith.constant dense<0.000000e+00> : vector<10xf32>
    %269 = vector.multi_reduction <add>, %268, %cst_142 [1] : vector<10x10xf32> to vector<10xf32>
    %270 = vector.shape_cast %269 : vector<10xf32> to vector<10x1xf32>
    %271 = tpu.reciprocal %270 {approx = true} : vector<10x1xf32> -> vector<10x1xf32>
    %272 = vector.broadcast %271 : vector<10x1xf32> to vector<10x10xf32>
    %273 = arith.mulf %268, %272 : vector<10x10xf32>
    %cst_143 = arith.constant dense<0.000000e+00> : vector<10x8xf32>
    %274 = tpu.matmul %273, %261, %cst_143 {dimension_numbers = #tpu.dot_dimension_numbers<[1], [0], [0], [1], [0, 0, 1, 1], [], []>} : vector<10x10xf32>, vector<10x8xf32>, vector<10x8xf32> -> vector<10x8xf32>
    %275 = vector.extract_strided_slice %213 {offsets = [8, 0], sizes = [8, 32], strides = [1, 1]} : vector<32x32xf32> to vector<8x32xf32>
    %cst_144 = arith.constant dense<0.000000e+00> : vector<10x32xf32>
    %276 = tpu.matmul %274, %275, %cst_144 {dimension_numbers = #tpu.dot_dimension_numbers<[1], [0], [0], [1], [0, 0, 1, 1], [], []>} : vector<10x8xf32>, vector<8x32xf32>, vector<10x32xf32> -> vector<10x32xf32>
    %277 = arith.addf %256, %276 : vector<10x32xf32>
    %278 = vector.extract_strided_slice %234 {offsets = [0, 16], sizes = [10, 8], strides = [1, 1]} : vector<10x96xf32> to vector<10x8xf32>
    %cst_145 = arith.constant 0.353553385 : f32
    %279 = vector.broadcast %cst_145 : f32 to vector<10x8xf32>
    %280 = arith.mulf %278, %279 : vector<10x8xf32>
    %281 = vector.extract_strided_slice %234 {offsets = [0, 48], sizes = [10, 8], strides = [1, 1]} : vector<10x96xf32> to vector<10x8xf32>
    %282 = vector.extract_strided_slice %234 {offsets = [0, 80], sizes = [10, 8], strides = [1, 1]} : vector<10x96xf32> to vector<10x8xf32>
    %cst_146 = arith.constant dense<0.000000e+00> : vector<10x10xf32>
    %283 = tpu.matmul %280, %281, %cst_146 {dimension_numbers = #tpu.dot_dimension_numbers<[1], [1], [0], [0], [0, 0, 1, 0], [], []>} : vector<10x8xf32>, vector<10x8xf32>, vector<10x10xf32> -> vector<10x10xf32>
    %284 = arith.addf %283, %5 : vector<10x10xf32>
    %cst_147 = arith.constant dense<0xFF800000> : vector<10xf32>
    %285 = vector.multi_reduction <maximumf>, %284, %cst_147 [1] : vector<10x10xf32> to vector<10xf32>
    %286 = vector.shape_cast %285 : vector<10xf32> to vector<10x1xf32>
    %287 = vector.broadcast %286 : vector<10x1xf32> to vector<10x10xf32>
    %288 = arith.subf %284, %287 : vector<10x10xf32>
    %289 = math.exp %288 : vector<10x10xf32>
    %cst_148 = arith.constant dense<0.000000e+00> : vector<10xf32>
    %290 = vector.multi_reduction <add>, %289, %cst_148 [1] : vector<10x10xf32> to vector<10xf32>
    %291 = vector.shape_cast %290 : vector<10xf32> to vector<10x1xf32>
    %292 = tpu.reciprocal %291 {approx = true} : vector<10x1xf32> -> vector<10x1xf32>
    %293 = vector.broadcast %292 : vector<10x1xf32> to vector<10x10xf32>
    %294 = arith.mulf %289, %293 : vector<10x10xf32>
    %cst_149 = arith.constant dense<0.000000e+00> : vector<10x8xf32>
    %295 = tpu.matmul %294, %282, %cst_149 {dimension_numbers = #tpu.dot_dimension_numbers<[1], [0], [0], [1], [0, 0, 1, 1], [], []>} : vector<10x10xf32>, vector<10x8xf32>, vector<10x8xf32> -> vector<10x8xf32>
    %296 = vector.extract_strided_slice %213 {offsets = [16, 0], sizes = [8, 32], strides = [1, 1]} : vector<32x32xf32> to vector<8x32xf32>
    %cst_150 = arith.constant dense<0.000000e+00> : vector<10x32xf32>
    %297 = tpu.matmul %295, %296, %cst_150 {dimension_numbers = #tpu.dot_dimension_numbers<[1], [0], [0], [1], [0, 0, 1, 1], [], []>} : vector<10x8xf32>, vector<8x32xf32>, vector<10x32xf32> -> vector<10x32xf32>
    %298 = arith.addf %277, %297 : vector<10x32xf32>
    %299 = vector.extract_strided_slice %234 {offsets = [0, 24], sizes = [10, 8], strides = [1, 1]} : vector<10x96xf32> to vector<10x8xf32>
    %cst_151 = arith.constant 0.353553385 : f32
    %300 = vector.broadcast %cst_151 : f32 to vector<10x8xf32>
    %301 = arith.mulf %299, %300 : vector<10x8xf32>
    %302 = vector.extract_strided_slice %234 {offsets = [0, 56], sizes = [10, 8], strides = [1, 1]} : vector<10x96xf32> to vector<10x8xf32>
    %303 = vector.extract_strided_slice %234 {offsets = [0, 88], sizes = [10, 8], strides = [1, 1]} : vector<10x96xf32> to vector<10x8xf32>
    %cst_152 = arith.constant dense<0.000000e+00> : vector<10x10xf32>
    %304 = tpu.matmul %301, %302, %cst_152 {dimension_numbers = #tpu.dot_dimension_numbers<[1], [1], [0], [0], [0, 0, 1, 0], [], []>} : vector<10x8xf32>, vector<10x8xf32>, vector<10x10xf32> -> vector<10x10xf32>
    %305 = arith.addf %304, %5 : vector<10x10xf32>
    %cst_153 = arith.constant dense<0xFF800000> : vector<10xf32>
    %306 = vector.multi_reduction <maximumf>, %305, %cst_153 [1] : vector<10x10xf32> to vector<10xf32>
    %307 = vector.shape_cast %306 : vector<10xf32> to vector<10x1xf32>
    %308 = vector.broadcast %307 : vector<10x1xf32> to vector<10x10xf32>
    %309 = arith.subf %305, %308 : vector<10x10xf32>
    %310 = math.exp %309 : vector<10x10xf32>
    %cst_154 = arith.constant dense<0.000000e+00> : vector<10xf32>
    %311 = vector.multi_reduction <add>, %310, %cst_154 [1] : vector<10x10xf32> to vector<10xf32>
    %312 = vector.shape_cast %311 : vector<10xf32> to vector<10x1xf32>
    %313 = tpu.reciprocal %312 {approx = true} : vector<10x1xf32> -> vector<10x1xf32>
    %314 = vector.broadcast %313 : vector<10x1xf32> to vector<10x10xf32>
    %315 = arith.mulf %310, %314 : vector<10x10xf32>
    %cst_155 = arith.constant dense<0.000000e+00> : vector<10x8xf32>
    %316 = tpu.matmul %315, %303, %cst_155 {dimension_numbers = #tpu.dot_dimension_numbers<[1], [0], [0], [1], [0, 0, 1, 1], [], []>} : vector<10x10xf32>, vector<10x8xf32>, vector<10x8xf32> -> vector<10x8xf32>
    %317 = vector.extract_strided_slice %213 {offsets = [24, 0], sizes = [8, 32], strides = [1, 1]} : vector<32x32xf32> to vector<8x32xf32>
    %cst_156 = arith.constant dense<0.000000e+00> : vector<10x32xf32>
    %318 = tpu.matmul %316, %317, %cst_156 {dimension_numbers = #tpu.dot_dimension_numbers<[1], [0], [0], [1], [0, 0, 1, 1], [], []>} : vector<10x8xf32>, vector<8x32xf32>, vector<10x32xf32> -> vector<10x32xf32>
    %319 = arith.addf %298, %318 : vector<10x32xf32>
    %320 = vector.broadcast %215 : vector<1x32xf32> to vector<10x32xf32>
    %321 = arith.addf %319, %320 : vector<10x32xf32>
    %322 = arith.addf %207, %321 : vector<10x32xf32>
    %cst_157 = arith.constant dense<0.000000e+00> : vector<10xf32>
    %323 = vector.multi_reduction <add>, %322, %cst_157 [1] : vector<10x32xf32> to vector<10xf32>
    %324 = vector.shape_cast %323 : vector<10xf32> to vector<10x1xf32>
    %cst_158 = arith.constant 3.200000e+01 : f32
    %325 = vector.broadcast %cst_158 : f32 to vector<10x1xf32>
    %326 = arith.divf %324, %325 : vector<10x1xf32>
    %327 = vector.broadcast %326 : vector<10x1xf32> to vector<10x32xf32>
    %328 = arith.subf %322, %327 : vector<10x32xf32>
    %329 = arith.mulf %328, %328 : vector<10x32xf32>
    %cst_159 = arith.constant dense<0.000000e+00> : vector<10xf32>
    %330 = vector.multi_reduction <add>, %329, %cst_159 [1] : vector<10x32xf32> to vector<10xf32>
    %331 = vector.shape_cast %330 : vector<10xf32> to vector<10x1xf32>
    %cst_160 = arith.constant 3.200000e+01 : f32
    %332 = vector.broadcast %cst_160 : f32 to vector<10x1xf32>
    %333 = arith.divf %331, %332 : vector<10x1xf32>
    %cst_161 = arith.constant 9.99999974E-6 : f32
    %334 = vector.broadcast %cst_161 : f32 to vector<10x1xf32>
    %335 = arith.addf %333, %334 : vector<10x1xf32>
    %336 = math.rsqrt %335 : vector<10x1xf32>
    %337 = vector.broadcast %336 : vector<10x1xf32> to vector<10x32xf32>
    %338 = arith.mulf %328, %337 : vector<10x32xf32>
    %339 = vector.broadcast %225 : vector<1x32xf32> to vector<10x32xf32>
    %340 = arith.mulf %338, %339 : vector<10x32xf32>
    %341 = vector.broadcast %227 : vector<1x32xf32> to vector<10x32xf32>
    %342 = arith.addf %340, %341 : vector<10x32xf32>
    %cst_162 = arith.constant dense<0.000000e+00> : vector<10x64xf32>
    %343 = tpu.matmul %342, %217, %cst_162 {dimension_numbers = #tpu.dot_dimension_numbers<[1], [0], [0], [1], [0, 0, 1, 1], [], []>} : vector<10x32xf32>, vector<32x64xf32>, vector<10x64xf32> -> vector<10x64xf32>
    %344 = vector.broadcast %219 : vector<1x64xf32> to vector<10x64xf32>
    %345 = arith.addf %343, %344 : vector<10x64xf32>
    %cst_163 = arith.constant 5.000000e-01 : f32
    %346 = vector.broadcast %cst_163 : f32 to vector<10x64xf32>
    %347 = arith.mulf %346, %345 : vector<10x64xf32>
    %cst_164 = arith.constant 0.707106769 : f32
    %348 = vector.broadcast %cst_164 : f32 to vector<10x64xf32>
    %349 = arith.mulf %345, %348 : vector<10x64xf32>
    %350 = math.absf %349 : vector<10x64xf32>
    %cst_165 = arith.constant 0.327591091 : f32
    %351 = vector.broadcast %cst_165 : f32 to vector<10x64xf32>
    %352 = arith.mulf %351, %350 : vector<10x64xf32>
    %cst_166 = arith.constant 1.000000e+00 : f32
    %353 = vector.broadcast %cst_166 : f32 to vector<10x64xf32>
    %354 = arith.addf %353, %352 : vector<10x64xf32>
    %cst_167 = arith.constant 1.000000e+00 : f32
    %355 = vector.broadcast %cst_167 : f32 to vector<10x64xf32>
    %356 = arith.divf %355, %354 : vector<10x64xf32>
    %cst_168 = arith.constant 1.06140542 : f32
    %357 = vector.broadcast %cst_168 : f32 to vector<10x64xf32>
    %358 = arith.mulf %357, %356 : vector<10x64xf32>
    %cst_169 = arith.constant -1.45315206 : f32
    %359 = vector.broadcast %cst_169 : f32 to vector<10x64xf32>
    %360 = arith.addf %358, %359 : vector<10x64xf32>
    %361 = arith.mulf %360, %356 : vector<10x64xf32>
    %cst_170 = arith.constant 1.42141378 : f32
    %362 = vector.broadcast %cst_170 : f32 to vector<10x64xf32>
    %363 = arith.addf %361, %362 : vector<10x64xf32>
    %364 = arith.mulf %363, %356 : vector<10x64xf32>
    %cst_171 = arith.constant -0.284496725 : f32
    %365 = vector.broadcast %cst_171 : f32 to vector<10x64xf32>
    %366 = arith.addf %364, %365 : vector<10x64xf32>
    %367 = arith.mulf %366, %356 : vector<10x64xf32>
    %cst_172 = arith.constant 0.254829586 : f32
    %368 = vector.broadcast %cst_172 : f32 to vector<10x64xf32>
    %369 = arith.addf %367, %368 : vector<10x64xf32>
    %370 = arith.mulf %369, %356 : vector<10x64xf32>
    %cst_173 = arith.constant 0.000000e+00 : f32
    %371 = vector.broadcast %cst_173 : f32 to vector<10x64xf32>
    %372 = arith.subf %371, %350 : vector<10x64xf32>
    %373 = arith.mulf %372, %350 : vector<10x64xf32>
    %374 = math.exp %373 : vector<10x64xf32>
    %375 = arith.mulf %370, %374 : vector<10x64xf32>
    %cst_174 = arith.constant 1.000000e+00 : f32
    %376 = vector.broadcast %cst_174 : f32 to vector<10x64xf32>
    %377 = arith.subf %376, %375 : vector<10x64xf32>
    %cst_175 = arith.constant 0.000000e+00 : f32
    %378 = vector.broadcast %cst_175 : f32 to vector<10x64xf32>
    %379 = arith.cmpf oge, %349, %378 : vector<10x64xf32>
    %cst_176 = arith.constant 0.000000e+00 : f32
    %380 = vector.broadcast %cst_176 : f32 to vector<10x64xf32>
    %381 = arith.subf %380, %377 : vector<10x64xf32>
    %382 = arith.select %379, %377, %381 : vector<10x64xi1>, vector<10x64xf32>
    %cst_177 = arith.constant 1.000000e+00 : f32
    %383 = vector.broadcast %cst_177 : f32 to vector<10x64xf32>
    %384 = arith.addf %383, %382 : vector<10x64xf32>
    %385 = arith.mulf %347, %384 : vector<10x64xf32>
    %cst_178 = arith.constant dense<0.000000e+00> : vector<10x32xf32>
    %386 = tpu.matmul %385, %221, %cst_178 {dimension_numbers = #tpu.dot_dimension_numbers<[1], [0], [0], [1], [0, 0, 1, 1], [], []>} : vector<10x64xf32>, vector<64x32xf32>, vector<10x32xf32> -> vector<10x32xf32>
    %387 = vector.broadcast %223 : vector<1x32xf32> to vector<10x32xf32>
    %388 = arith.addf %386, %387 : vector<10x32xf32>
    %389 = arith.addf %342, %388 : vector<10x32xf32>
    %cst_179 = arith.constant dense<0.000000e+00> : vector<10xf32>
    %390 = vector.multi_reduction <add>, %389, %cst_179 [1] : vector<10x32xf32> to vector<10xf32>
    %391 = vector.shape_cast %390 : vector<10xf32> to vector<10x1xf32>
    %cst_180 = arith.constant 3.200000e+01 : f32
    %392 = vector.broadcast %cst_180 : f32 to vector<10x1xf32>
    %393 = arith.divf %391, %392 : vector<10x1xf32>
    %394 = vector.broadcast %393 : vector<10x1xf32> to vector<10x32xf32>
    %395 = arith.subf %389, %394 : vector<10x32xf32>
    %396 = arith.mulf %395, %395 : vector<10x32xf32>
    %cst_181 = arith.constant dense<0.000000e+00> : vector<10xf32>
    %397 = vector.multi_reduction <add>, %396, %cst_181 [1] : vector<10x32xf32> to vector<10xf32>
    %398 = vector.shape_cast %397 : vector<10xf32> to vector<10x1xf32>
    %cst_182 = arith.constant 3.200000e+01 : f32
    %399 = vector.broadcast %cst_182 : f32 to vector<10x1xf32>
    %400 = arith.divf %398, %399 : vector<10x1xf32>
    %cst_183 = arith.constant 9.99999974E-6 : f32
    %401 = vector.broadcast %cst_183 : f32 to vector<10x1xf32>
    %402 = arith.addf %400, %401 : vector<10x1xf32>
    %403 = math.rsqrt %402 : vector<10x1xf32>
    %404 = vector.broadcast %403 : vector<10x1xf32> to vector<10x32xf32>
    %405 = arith.mulf %395, %404 : vector<10x32xf32>
    %406 = vector.broadcast %229 : vector<1x32xf32> to vector<10x32xf32>
    %407 = arith.mulf %405, %406 : vector<10x32xf32>
    %408 = vector.broadcast %231 : vector<1x32xf32> to vector<10x32xf32>
    %409 = arith.addf %407, %408 : vector<10x32xf32>
    %410 = vector.extract_strided_slice %409 {offsets = [0, 0], sizes = [2, 32], strides = [1, 1]} : vector<10x32xf32> to vector<2x32xf32>
    %c0_184 = arith.constant 0 : index
    %c0_185 = arith.constant 0 : index
    %411 = vector.load %arg16[%c0_184, %c0_185] : memref<32x2xf32, #tpu.memory_space<vmem>>, vector<32x2xf32>
    %cst_186 = arith.constant dense<0.000000e+00> : vector<2x2xf32>
    %412 = tpu.matmul %410, %411, %cst_186 {dimension_numbers = #tpu.dot_dimension_numbers<[1], [0], [0], [1], [0, 0, 1, 1], [], []>} : vector<2x32xf32>, vector<32x2xf32>, vector<2x2xf32> -> vector<2x2xf32>
    %c0_187 = arith.constant 0 : index
    %c0_188 = arith.constant 0 : index
    %413 = vector.load %arg17[%c0_187, %c0_188] : memref<1x2xf32, #tpu.memory_space<vmem>>, vector<1x2xf32>
    %414 = vector.broadcast %413 : vector<1x2xf32> to vector<2x2xf32>
    %415 = arith.addf %412, %414 : vector<2x2xf32>
    %c0_189 = arith.constant 0 : index
    %c0_190 = arith.constant 0 : index
    %416 = vector.load %arg18[%c0_189, %c0_190] : memref<2x2xf32, #tpu.memory_space<vmem>>, vector<2x2xf32>
    tpu.vector_store %arg18[%c0_189, %c0_190], %415 {strides = array<i32>} : memref<2x2xf32, #tpu.memory_space<vmem>>, vector<2x2xf32>,
    return
  }
}

</mosaic_0001>

<bundles_post_ra>
// kernel: vit_forward.1
= control target key start
LH: loop header
LB: loop body
LE: loop exit
PB: predicated region body
PF: predicated region fallthrough
CT: control target
= control target key end

     0   :  { %s5153_s0 = inlined_call_operand.vmem [shape: f32[10,256], index: 0, kind: input, shape index: {}]   ;;  %s5154_s1 = inlined_call_operand.vmem [shape: f32[10,32], index: 1, kind: input, shape index: {}]   ;;  %s5155_s2 = inlined_call_operand.vmem [shape: f32[10,10], index: 2, kind: input, shape index: {}]   ;;  %s5156_s3 = inlined_call_operand.vmem [shape: f32[256,32], index: 3, kind: input, shape index: {}]   ;;  %s5157_s4 = inlined_call_operand.vmem [shape: f32[2,32,96], index: 4, kind: input, shape index: {}]   ;;  %s5158_s5 = inlined_call_operand.vmem [shape: f32[2,1,96], index: 5, kind: input, shape index: {}]   ;;  %s5159_s6 = inlined_call_operand.vmem [shape: f32[2,32,32], index: 6, kind: input, shape index: {}]   ;;  %s5160_s7 = inlined_call_operand.vmem [shape: f32[2,1,32], index: 7, kind: input, shape index: {}]   ;;  %s5161_s8 = inlined_call_operand.vmem [shape: f32[2,32,64], index: 8, kind: input, shape index: {}]   ;;  %s5162_s9 = inlined_call_operand.vmem [shape: f32[2,1,64], index: 9, kind: input, shape index: {}]   ;;  %s5163_s10 = inlined_call_operand.vmem [shape: f32[2,64,32], index: 10, kind: input, shape index: {}]   ;;  %s5164_s11 = inlined_call_operand.vmem [shape: f32[2,1,32], index: 11, kind: input, shape index: {}]   ;;  %s5165_s12 = inlined_call_operand.vmem [shape: f32[2,1,32], index: 12, kind: input, shape index: {}]   ;;  %s5166_s13 = inlined_call_operand.vmem [shape: f32[2,1,32], index: 13, kind: input, shape index: {}]   ;;  %s5167_s14 = inlined_call_operand.vmem [shape: f32[2,1,32], index: 14, kind: input, shape index: {}]   ;;  %s5168_s15 = inlined_call_operand.vmem [shape: f32[2,1,32], index: 15, kind: input, shape index: {}]   ;;  %s5169_s16 = inlined_call_operand.vmem [shape: f32[32,2], index: 16, kind: input, shape index: {}]   ;;  %s5170_s17 = inlined_call_operand.vmem [shape: f32[1,2], index: 17, kind: input, shape index: {}]   ;;  %s5171_s18 = inlined_call_operand.hbm [shape: f32[2,2], index: 18, kind: output, shape index: {}]  }
   0x1   :  { %5180 = sst [smem:[#allocation5_spill]] %s5153_s0 }
   0x2   :  { %5181 = sst [smem:[#allocation6_spill]] %s5154_s1 }
   0x3   :  { %5182 = sst [smem:[#allocation7_spill]] %s5155_s2 }
   0x4   :  { %v80_v0 = vld [vmem:[%s5156_s3 + $0x80] sm:$0xff]  ;;  %v81_v1 = vld [vmem:[%s5156_s3 + $0x88] sm:$0xff]  ;;  %v82_v5 = vld [vmem:[%s5156_s3 + $0x90] sm:$0xff]  ;;  %s5183_s21 = sld [smem:[#allocation5_spill]] }
   0x5   :  { %v64_v2 = vld [vmem:[%s5156_s3] sm:$0xff]  ;;  %v3974_v3 = vpack.c.bf16 %v81_v1, %v80_v0  ;;  %v65_v4 = vld [vmem:[%s5156_s3 + $0x8] sm:$0xff]  ;;  %v83_v6 = vld [vmem:[%s5156_s3 + $0x98] sm:$0xff] }
   0x6   :  { %v3976_v7 = vpack.c.bf16 %v65_v4, %v64_v2  ;;  %v3978_v8 = vpack.c.bf16 %v83_v6, %v82_v5  ;;  %v66_v9 = vld [vmem:[%s5156_s3 + $0x10] sm:$0xff]  ;;  %v67_v10 = vld [vmem:[%s5156_s3 + $0x18] sm:$0xff]  ;;  %v84_v11 = vld [vmem:[%s5156_s3 + $0xa0] sm:$0xff] }
   0x7   :  { %3975 = vmatprep.subr.bf16.mxu0 %v3974_v3  ;;  %v85_v12 = vld [vmem:[%s5156_s3 + $0xa8] sm:$0xff]  ;;  %v3980_v13 = vpack.c.bf16 %v67_v10, %v66_v9  ;;  %v68_v15 = vld [vmem:[%s5156_s3 + $0x20] sm:$0xff]  ;;  %v86_v17 = vld [vmem:[%s5156_s3 + $0xb0] sm:$0xff] }
   0x8   :  { %3977 = vmatpush3.bf16.msra.mxu0 %v3976_v7  ;;  %v3982_v14 = vpack.c.bf16 %v85_v12, %v84_v11  ;;  %v69_v16 = vld [vmem:[%s5156_s3 + $0x28] sm:$0xff]  ;;  %v87_v18 = vld [vmem:[%s5156_s3 + $0xb8] sm:$0xff]  ;;  %v70_v21 = vld [vmem:[%s5156_s3 + $0x30] sm:$0xff] }
   0x9   :  { %3979 = vmatprep.subr.bf16.mxu0 %v3978_v8  ;;  %v3984_v19 = vpack.c.bf16 %v69_v16, %v68_v15  ;;  %v3986_v20 = vpack.c.bf16 %v87_v18, %v86_v17  ;;  %v71_v22 = vld [vmem:[%s5156_s3 + $0x38] sm:$0xff]  ;;  %v88_v23 = vld [vmem:[%s5156_s3 + $0xc0] sm:$0xff]  ;;  %v89_v24 = vld [vmem:[%s5156_s3 + $0xc8] sm:$0xff] }
   0xa   :  { %v61_v25 = vld [vmem:[%s5183_s21 + $0x8] sm:$0xff]  ;;  %v3988_v26 = vpack.c.bf16 %v71_v22, %v70_v21 }
   0xb   :  { %162 = vmatprep.mubr.f32.mxu0 %v61_v25 }
   0xc   :  { %3981 = vmatpush3.bf16.msra.mxu0 %v3980_v13 }
   0xd   :  { %3983 = vmatprep.subr.bf16.mxu0 %v3982_v14 }
  0x10   :  { %3985 = vmatpush3.bf16.msra.mxu0 %v3984_v19 }
  0x11   :  { %23 = vsyncpa [#allocation3], 0  ;;  %3987 = vmatprep.subr.bf16.mxu0 %v3986_v20  ;;  %v3990_v27 = vpack.c.bf16 %v89_v24, %v88_v23  ;;  %v72_v28 = vld [vmem:[%s5156_s3 + $0x40] sm:$0xff]  ;;  %v73_v29 = vld [vmem:[%s5156_s3 + $0x48] sm:$0xff]  ;;  %s5184_s22 = sld [smem:[#allocation6_spill]]  ;;  %vm209_vm0 = vcmask 261120  }
  0x12   :  { %v90_v30 = vld [vmem:[%s5156_s3 + $0xd0] sm:$0xff]  ;;  %v91_v31 = vld [vmem:[%s5156_s3 + $0xd8] sm:$0xff]  ;;  %v3992_v32 = vpack.c.bf16 %v73_v29, %v72_v28  ;;  %v92_v36 = vld [vmem:[%s5156_s3 + $0xe0] sm:$0xff]  ;;  %vm299_vm1 = vcmask 64512   ;;  %s4400_s26 = smov 96   ;;  %s5187_s28 = sld [smem:[#allocation7_spill]] }
  0x13   :  { %v3994_v33 = vpack.c.bf16 %v91_v31, %v90_v30  ;;  %v74_v34 = vld [vmem:[%s5156_s3 + $0x50] sm:$0xff]  ;;  %v75_v35 = vld [vmem:[%s5156_s3 + $0x58] sm:$0xff]  ;;  %v93_v37 = vld [vmem:[%s5156_s3 + $0xe8] sm:$0xff]  ;;  %vm389_vm3 = vcmask 74752   ;;  %vm385_vm4 = vcmask 80896   ;;  %s4401_s0 = smov 64  }
  0x14   :  { %3989 = vmatpush3.bf16.msra.mxu0 %v3988_v26  ;;  %v3996_v38 = vpack.c.bf16 %v75_v35, %v74_v34  ;;  %v3998_v39 = vpack.c.bf16 %v93_v37, %v92_v36  ;;  %v76_v40 = vld [vmem:[%s5156_s3 + $0x60] sm:$0xff]  ;;  %v77_v41 = vld [vmem:[%s5156_s3 + $0x68] sm:$0xff]  ;;  %v94_v42 = vld [vmem:[%s5156_s3 + $0xf0] sm:$0xff]  ;;  %s4402_s19 = smov 88   ;;  %s4403_s1 = smov 120   ;;  %vm420_vm5 = vcmask 1041408  }
  0x15   :  { %3991 = vmatprep.subr.bf16.mxu0 %v3990_v27  ;;  %v95_v43 = vld [vmem:[%s5156_s3 + $0xf8] sm:$0xff]  ;;  %v4000_v44 = vpack.c.bf16 %v77_v41, %v76_v40  ;;  %v78_v46 = vld [vmem:[%s5156_s3 + $0x70] sm:$0xff]  ;;  %v60_v49 = vld [vmem:[%s5183_s21] sm:$0xff]  ;;  %vm4404_vm6 = vmmov 1   ;;  %s4406_s20 = smov 112   ;;  %s4408_s2 = smov 72  }
  0x16   :  { %v4002_v45 = vpack.c.bf16 %v95_v43, %v94_v42  ;;  %v79_v47 = vld [vmem:[%s5156_s3 + $0x78] sm:$0xff]  ;;  %v62_v51 = vld [vmem:[%s5183_s21 + $0x10] sm:$0x3]  ;;  %v175_v52 = vld [vmem:[%s5157_s4] sm:$0xff]  ;;  %s5177_s23 = smov 104   ;;  %s5176_s24 = smov 48  }
  0x17   :  { %v4004_v48 = vpack.c.bf16 %v79_v47, %v78_v46  ;;  %v63_v50 = vld [vmem:[%s5183_s21 + $0x18] sm:$0x3]  ;;  %v176_v53 = vld [vmem:[%s5157_s4 + $0x8] sm:$0xff]  ;;  %v177_v55 = vld [vmem:[%s5157_s4 + $0x10] sm:$0xff]  ;;  %s4405_s21 = smov 80   ;;  %s5175_s25 = smov 40  }
  0x18   :  { %3993 = vmatpush3.bf16.msra.mxu0 %v3992_v32  ;;  %v4006_v54 = vpack.c.bf16 %v176_v53, %v175_v52  ;;  %v178_v56 = vld [vmem:[%s5157_s4 + $0x18] sm:$0xff]  ;;  %v96_v60 = vld [vmem:[%s5184_s22] sm:$0xff]  ;;  %v97_v0 = vld [vmem:[%s5184_s22 + $0x8] sm:$0x3]  ;;  %s5179_s22 = smov 56   ;;  %vm1442_vm8 = vcmask 254976  }
  0x19   :  { %3995 = vmatprep.subr.bf16.mxu0 %v3994_v33  ;;  %v4010_v57 = vpack.c.bf16 %v178_v56, %v177_v55  ;;  %v3424_v4 = vld [vmem:[%s5158_s5] ss:$0 sm:$0xff]  ;;  %vm4658_vm2 = vmpackc.low %vm299_vm1, %vm299_vm1  ;;  %v4673_v17 = vld [vmem:[%s5187_s28 + $0x8] sm:$0x3]  ;;  %vm1630_vm11 = vcmask 523264   ;;  %vm4413_vm14 = vmmov 0  }
  0x1a   :  { %4007 = vmatprep.subr.bf16.mxu1 %v4006_v54  ;;  %v4678_v18 = vld [vmem:[%s5187_s28] sm:$0xff]  ;;  %vm4690_vm7 = vmpackc.low %vm420_vm5, %vm4404_vm6  ;;  %vm3408_vm15 = vcmask 9216  }
  0x1b   :  { %4009 = vmatpush3.bf16.msra.mxu1 %v4006_v54  ;;  %v3541_v34 = vld [vmem:[%s5160_s7 + $0x1] ss:$0 sm:$0xff] }
  0x1c   :  { %3997 = vmatpush3.bf16.msra.mxu0 %v3996_v38  ;;  %4011 = vmatprep.subr.bf16.mxu1 %v4010_v57 }
  0x1d   :  { %3999 = vmatprep.subr.bf16.mxu0 %v3998_v39 }
  0x1f   :  { %4013 = vmatpush3.bf16.msra.mxu1 %v4010_v57 }
  0x20   :  { %4001 = vmatpush3.bf16.msra.mxu0 %v4000_v44 }
  0x21   :  { %4003 = vmatprep.subr.bf16.mxu0 %v4002_v45 }
  0x24   :  { %4005 = vmatpush3.bf16.msra.mxu0 %v4004_v48 }
  0x27   :  { %163 = vmatmul.mubr.f32.vlgmr.msra.gmra.mrb[0].mxu0 %v60_v49 }
  0x28   :  { %167 = vmatprep.mubr.f32.mxu0 %v63_v50 }
  0x2b   :  { %168 = vmatmul.mubr.f32.gmra.mrb[2].mxu0 %v62_v51 }
  0xfa   :  { %v3586_v58 = vpop.f32.mrb[0].mxu0 }
  0xfb   :  { %v3587_v59 = vpop.f32.mrb[1].mxu0 }
  0xfc   :  { %v3588_v61 = vadd.f32 %v3587_v59, %v3586_v58 }
  0xfe   :  { %v3589_v62 = vpop.f32.mrb[2].mxu0  ;;  %v4634_v63 = vadd.f32 %v3588_v61, %v96_v60 }
  0xff   :  { %v3590_v1 = vpop.f32.mrb[3].mxu0 }
 0x100   :  { %v3591_v2 = vadd.f32 %v3590_v1, %v3589_v62  ;;  %3737 = vmatprep.mubr.msk.f32.mxu1 %vm209_vm0, %v4634_v63 }
 0x102   :  { %v4641_v3 = vadd.f32 %v3591_v2, %v97_v0 }
 0x104   :  { %3738 = vmatmul.mubr.msk.f32.vlgmr.msra.gmra.mrb[0].mxu1 %vm209_vm0, %v4641_v3 }
 0x1d7   :  { %v3739_v5 = vpop.f32.mrb[0].mxu1 }
 0x1d8   :  { %v288_v6 = vadd.f32 %v3739_v5, %v3424_v4  ;;  %v282_v7 = vpop.f32.mrb[1].mxu1 }
 0x1d9   :  { %v283_v8 = vadd.f32 %v3424_v4, %v282_v7 }
 0x1da   :  { %v4666_v16 = vmul.f32 0.35355338, %v288_v6 }
 0x1db   :  { %v4648_v9 = vpack.i.bf16 %v288_v6, %v283_v8  ;;  %v4650_v10 = vmul.f32 0.35355338, %v283_v8 }
 0x1dd   :  { %4201 = vrot.lane.b32.xlu0 %v4648_v9, %s4400_s26  ;;  %3744 = vmatprep.mubr.msk.f32.mxu1 %vm299_vm1, %v4650_v10 }
 0x24f   :  { %v4202_v11 = vpop.permute.xlu0 %4201 }
 0x250   :  { %v4204_v12 = vunpack.i.h.bf16 %v4202_v11  ;;  %v4203_v13 = vunpack.i.l.bf16 %v4202_v11 }
 0x252   :  { %v4014_v15 = vpack.c.bf16 %v4204_v12, %v4203_v13 }
 0x254   :  { %4016 = vmatprep.subr.msk.bf16.mxu1 %vm4658_vm2, %v4014_v15 }
 0x255   :  { %4019 = vmatpush3.bf16.xpose.msk.msra.mxu1 %vm4658_vm2, %v4014_v15 }
 0x25c   :  { %3745 = vmatmul.mubr.msk.f32.vlgmr.msra.gmra.mrb[2].mxu1 %vm299_vm1, %v4666_v16 }
 0x32f   :  { %v3746_v19 = vpop.f32.mrb[2].mxu1 }
 0x330   :  { %v382_v20 = vadd.f32 %v3746_v19, %v4673_v17  ;;  %v376_v21 = vpop.f32.mrb[3].mxu1 }
 0x331   :  { %v377_v22 = vadd.f32 %v376_v21, %v4678_v18 }
 0x332   :  { %v390_v23 = vsel %vm389_vm3, %v382_v20, -inf }
 0x333   :  { %391 = vmax.xlane.f32.xlu1 %v390_v23  ;;  %v386_v24 = vsel %vm385_vm4, %v377_v22, -inf }
 0x334   :  { %387 = vmax.xlane.f32.xlu0 %v386_v24 }
 0x344   :  { %4206 = vrot.lane.b32.xlu1 %v4648_v9, %s4401_s0 }
 0x348   :  { %4211 = vrot.lane.b32.xlu1 %v4648_v9, %s4402_s19 }
 0x34a   :  { %500 = vrot.lane.b32.xlu0 %v4666_v16, %s4403_s1 }
 0x3c0   :  { %v392_v25 = vpop.xlane.xlu1 %391 }
 0x3c1   :  { %v394_v26 = vsub.f32 %v382_v20, %v392_v25  ;;  %v388_v27 = vpop.xlane.xlu0 %387 }
 0x3c2   :  { %v393_v28 = vsub.f32 %v377_v22, %v388_v27 }
 0x3c3   :  { %v397_v29 = vmul.f32 1.442695, %v394_v26 }
 0x3c4   :  { %v395_v30 = vmul.f32 1.442695, %v393_v28  ;;  %v4207_v31 = vpop.permute.xlu1 %4206 }
 0x3c5   :  { %4280 = vpow2.f32 %v397_v29  ;;  %v4209_v32 = vunpack.i.h.bf16 %v4207_v31  ;;  %v4208_v33 = vunpack.i.l.bf16 %v4207_v31  ;;  %v501_v57 = vpop.permute.xlu0 %500 }
 0x3c6   :  { %4282 = vpow2.f32 %v395_v30 }
 0x3c7   :  { %v4020_v35 = vpack.c.bf16 %v4209_v32, %v4208_v33 }
 0x3c8   :  { %v4212_v36 = vpop.permute.xlu1 %4211 }
 0x3c9   :  { %v4214_v37 = vunpack.i.h.bf16 %v4212_v36  ;;  %v4213_v38 = vunpack.i.l.bf16 %v4212_v36  ;;  %4022 = vmatprep.subr.msk.bf16.mxu1 %vm4690_vm7, %v4020_v35 }
 0x3ca   :  { %4025 = vmatpush3.bf16.msk.msra.mxu1 %vm4690_vm7, %v4020_v35 }
 0x3cb   :  { %v4026_v39 = vpack.c.bf16 %v4214_v37, %v4213_v38 }
 0x3cd   :  { %4028 = vmatprep.subr.msk.bf16.mxu1 %vm4658_vm2, %v4026_v39 }
 0x3cf   :  { %v4281_v40 = vpop.eup %4280 }
 0x3d0   :  { %v402_v41 = vsel %vm389_vm3, %v4281_v40, 0.0  ;;  %v4283_v42 = vpop.eup %4282 }
 0x3d1   :  { %403 = vadd.xlane.f32.xlu1 %v402_v41  ;;  %v399_v43 = vsel %vm385_vm4, %v4283_v42, 0.0 }
 0x3d5   :  { %400 = vadd.xlane.f32.xlu1 %v399_v43 }
 0x3e6   :  { %498 = vrot.lane.b32.xlu1 %v4650_v10, %s4403_s1 }
 0x3ea   :  { %4216 = vrot.lane.b32.xlu1 %v4648_v9, %s4405_s21 }
 0x3ee   :  { %861 = vrot.lane.b32.xlu1 %v4650_v10, %s4406_s20 }
 0x3f2   :  { %863 = vrot.lane.b32.xlu1 %v4666_v16, %s4406_s20 }
 0x45e   :  { %v404_v44 = vpop.xlane.xlu1 %403 }
 0x45f   :  { %4284 = vrcp.f32 %v404_v44 }
 0x462   :  { %v401_v45 = vpop.xlane.xlu1 %400 }
 0x463   :  { %4286 = vrcp.f32 %v401_v45 }
 0x466   :  { %v499_v46 = vpop.permute.xlu1 %498 }
 0x469   :  { %v4285_v50 = vpop.eup %4284 }
 0x46a   :  { %v4217_v47 = vpop.permute.xlu1 %4216  ;;  %v408_v55 = vmul.f32 %v4285_v50, %v4281_v40  ;;  %v181_v50 = vld [vmem:[%s5159_s6 + $0x8] sm:$0xff] }
 0x46b   :  { %v4219_v48 = vunpack.i.h.bf16 %v4217_v47  ;;  %v4218_v49 = vunpack.i.l.bf16 %v4217_v47 }
 0x46d   :  { %v4287_v51 = vpop.eup %4286  ;;  %v4038_v52 = vpack.c.bf16 %v4219_v48, %v4218_v49 }
 0x46e   :  { %v862_v53 = vpop.permute.xlu1 %861  ;;  %v407_v54 = vmul.f32 %v4287_v51, %v4283_v42  ;;  %v180_v51 = vld [vmem:[%s5159_s6] sm:$0xff] }
 0x46f   :  { %4040 = vmatprep.subr.msk.bf16.mxu0 %vm4658_vm2, %v4038_v52  ;;  %3782 = vmatprep.mubr.msk.f32.mxu0 %vm299_vm1, %v862_v53 }
 0x470   :  { %3751 = vmatprep.mubr.msk.f32.mxu1 %vm385_vm4, %v407_v54  ;;  %4043 = vmatpush3.bf16.xpose.msk.msra.mxu0 %vm4658_vm2, %v4038_v52 }
 0x471   :  { %3752 = vmatmul.mubr.msk.f32.vlgmr.msra.gmra.mrb[4].mxu1 %vm385_vm4, %v408_v55 }
 0x472   :  { %4031 = vmatpush3.bf16.xpose.msk.msra.mxu1 %vm4658_vm2, %v4026_v39  ;;  %3758 = vmatprep.mubr.msk.f32.mxu1 %vm299_vm1, %v499_v46  ;;  %v864_v56 = vpop.permute.xlu1 %863 }
 0x477   :  { %3783 = vmatmul.mubr.msk.f32.vlgmr.msra.gmra.mrb[4].mxu0 %vm299_vm1, %v864_v56 }
 0x479   :  { %3759 = vmatmul.mubr.msk.f32.vlgmr.msra.gmra.mrb[6].mxu1 %vm299_vm1, %v501_v57 }
 0x544   :  { %v4722_v58 = vpop.f32.mrb[4].mxu1 }
 0x545   :  { %v4724_v59 = vpop.f32.mrb[5].mxu1 }
 0x54a   :  { %v3784_v60 = vpop.f32.mrb[4].mxu0 }
 0x54b   :  { %v943_v61 = vpop.f32.mrb[5].mxu0  ;;  %v949_v24 = vadd.f32 %v3784_v60, %v4673_v17 }
 0x54c   :  { %v3760_v62 = vpop.f32.mrb[6].mxu1  ;;  %v944_v22 = vadd.f32 %v943_v61, %v4678_v18 }
 0x54d   :  { %v586_v0 = vadd.f32 %v3760_v62, %v4673_v17  ;;  %v580_v1 = vpop.f32.mrb[7].mxu1  ;;  %v955_v25 = vsel %vm389_vm3, %v949_v24, -inf }
 0x54e   :  { %v581_v2 = vadd.f32 %v580_v1, %v4678_v18  ;;  %v952_v23 = vsel %vm385_vm4, %v944_v22, -inf }
 0x54f   :  { %v592_v4 = vsel %vm389_vm3, %v586_v0, -inf }
 0x550   :  { %593 = vmax.xlane.f32.xlu0 %v592_v4  ;;  %v589_v5 = vsel %vm385_vm4, %v581_v2, -inf }
 0x551   :  { %590 = vmax.xlane.f32.xlu1 %v589_v5 }
 0x5dd   :  { %v594_v6 = vpop.xlane.xlu0 %593 }
 0x5de   :  { %v596_v7 = vsub.f32 %v586_v0, %v594_v6  ;;  %v591_v8 = vpop.xlane.xlu1 %590 }
 0x5df   :  { %v595_v11 = vsub.f32 %v581_v2, %v591_v8 }
 0x5e0   :  { %v599_v12 = vmul.f32 1.442695, %v596_v7 }
 0x5e1   :  { %v597_v13 = vmul.f32 1.442695, %v595_v11 }
 0x5e2   :  { %4288 = vpow2.f32 %v599_v12  ;;  %v182_v12 = vld [vmem:[%s5159_s6 + $0x10] sm:$0xff] }
 0x5e3   :  { %4290 = vpow2.f32 %v597_v13 }
 0x5ec   :  { %v4289_v15 = vpop.eup %4288 }
 0x5ed   :  { %v4291_v19 = vpop.eup %4290  ;;  %v604_v20 = vsel %vm389_vm3, %v4289_v15, 0.0 }
 0x5ee   :  { %605 = vadd.xlane.f32.xlu0 %v604_v20  ;;  %v601_v21 = vsel %vm385_vm4, %v4291_v19, 0.0 }
 0x5ef   :  { %602 = vadd.xlane.f32.xlu1 %v601_v21 }
 0x600   :  { %4221 = vrot.lane.b32.xlu1 %v4648_v9, %s5179_s22 }
 0x604   :  { %4226 = vrot.lane.b32.xlu0 %v4648_v9, %s4408_s2  ;;  %1145 = vrot.lane.b32.xlu1 %v4650_v10, %s5177_s23 }
 0x608   :  { %1147 = vrot.lane.b32.xlu1 %v4666_v16, %s5177_s23 }
 0x623   :  { %953 = vmax.xlane.f32.xlu0 %v952_v23 }
 0x62c   :  { %956 = vmax.xlane.f32.xlu1 %v955_v25 }
 0x63d   :  { %4231 = vrot.lane.b32.xlu1 %v4648_v9, %s5176_s24  ;;  %s4415_s24 = smov [#allocation2]  }
 0x63e   :  { %s3416_s22 = sshll.u32 %s4415_s24, 4  ;;  %s3417_s22 = int_to_ptr.vmem [resolvable:$true] %s3416_s22 }
 0x63f   :  { %p4381_p1 = scmp.lt.s32.totalorder %s3417_s22, %s3417_s22 }
 0x641   :  { %4236 = vrot.lane.b32.xlu1 %v4648_v9, %s5175_s25 }
 0x67b   :  { %v606_v10 = vpop.xlane.xlu0 %605 }
 0x67c   :  { %4292 = vrcp.f32 %v606_v10  ;;  %v603_v16 = vpop.xlane.xlu1 %602 }
 0x67d   :  { %4294 = vrcp.f32 %v603_v16 }
 0x67f   :  { %v4227_v26 = vpop.permute.xlu0 %4226 }
 0x680   :  { %v4229_v27 = vunpack.i.h.bf16 %v4227_v26  ;;  %v4228_v28 = vunpack.i.l.bf16 %v4227_v26  ;;  %v4222_v29 = vpop.permute.xlu1 %4221 }
 0x681   :  { %v4224_v30 = vunpack.i.h.bf16 %v4222_v29  ;;  %v4223_v31 = vunpack.i.l.bf16 %v4222_v29  ;;  %v183_v29 = vld [vmem:[%s5159_s6 + $0x18] sm:$0xff] }
 0x682   :  { %v4050_v32 = vpack.c.bf16 %v4229_v27, %v4228_v28 }
 0x683   :  { %v4032_v33 = vpack.c.bf16 %v4224_v30, %v4223_v31 }
 0x684   :  { %4052 = vmatprep.subr.msk.bf16.mxu0 %vm4658_vm2, %v4050_v32  ;;  %v1146_v35 = vpop.permute.xlu1 %1145 }
 0x685   :  { %4034 = vmatprep.subr.msk.bf16.mxu1 %vm4690_vm7, %v4032_v33  ;;  %4055 = vmatpush3.bf16.xpose.msk.msra.mxu0 %vm4658_vm2, %v4050_v32 }
 0x686   :  { %v4293_v9 = vpop.eup %4292  ;;  %3801 = vmatprep.mubr.msk.f32.mxu0 %vm299_vm1, %v1146_v35  ;;  %4037 = vmatpush3.bf16.msk.msra.mxu1 %vm4690_vm7, %v4032_v33 }
 0x687   :  { %v4295_v36 = vpop.eup %4294  ;;  %v610_v38 = vmul.f32 %v4293_v9, %v4289_v15  ;;  %3768 = vmatprep.subr.mxu1 %v181_v50 }
 0x688   :  { %v609_v37 = vmul.f32 %v4295_v36, %v4291_v19  ;;  %v1148_v39 = vpop.permute.xlu1 %1147 }
 0x68a   :  { %3765 = vmatprep.mubr.msk.f32.mxu1 %vm385_vm4, %v609_v37 }
 0x68b   :  { %3766 = vmatmul.mubr.msk.f32.vlgmr.msra.gmra.mrb[8].mxu1 %vm385_vm4, %v610_v38  ;;  %v3463_v38 = vld [vmem:[%s5160_s7] ss:$0 sm:$0xff] }
 0x68c   :  { %3802 = vmatmul.mubr.msk.f32.vlgmr.msra.gmra.mrb[6].mxu0 %vm299_vm1, %v1148_v39  ;;  %3769 = vmatpush3.msra.mxu1 %v181_v50 }
 0x68d   :  { %3773 = vmatprep.subr.mxu1 %v180_v51 }
 0x6b0   :  { %v954_v40 = vpop.xlane.xlu0 %953 }
 0x6b1   :  { %v958_v41 = vsub.f32 %v944_v22, %v954_v40 }
 0x6b3   :  { %v960_v42 = vmul.f32 1.442695, %v958_v41 }
 0x6b5   :  { %4296 = vpow2.f32 %v960_v42 }
 0x6b9   :  { %v957_v43 = vpop.xlane.xlu1 %956 }
 0x6ba   :  { %v959_v44 = vsub.f32 %v949_v24, %v957_v43 }
 0x6bc   :  { %v962_v45 = vmul.f32 1.442695, %v959_v44 }
 0x6bd   :  { %v4232_v53 = vpop.permute.xlu1 %4231 }
 0x6be   :  { %4298 = vpow2.f32 %v962_v45  ;;  %v4234_v55 = vunpack.i.h.bf16 %v4232_v53  ;;  %v4233_v56 = vunpack.i.l.bf16 %v4232_v53 }
 0x6bf   :  { %v4297_v46 = vpop.eup %4296 }
 0x6c0   :  { %v964_v47 = vsel %vm385_vm4, %v4297_v46, 0.0  ;;  %v4044_v0 = vpack.c.bf16 %v4234_v55, %v4233_v56  ;;  %v186_v56 = vld [vmem:[%s5161_s8 + $0x8] sm:$0xff] }
 0x6c1   :  { %965 = vadd.xlane.f32.xlu0 %v964_v47  ;;  %v4237_v6 = vpop.permute.xlu1 %4236 }
 0x6c2   :  { %v4238_v13 = vunpack.i.l.bf16 %v4237_v6 }
 0x6c8   :  { %v4299_v48 = vpop.eup %4298 }
 0x6c9   :  { %v967_v49 = vsel %vm389_vm3, %v4299_v48, 0.0 }
 0x6ca   :  { %968 = vadd.xlane.f32.xlu0 %v967_v49 }
 0x74e   :  { %v966_v52 = vpop.xlane.xlu0 %965 }
 0x74f   :  { %4300 = vrcp.f32 %v966_v52 }
 0x757   :  { %v969_v54 = vpop.xlane.xlu0 %968 }
 0x758   :  { %4302 = vrcp.f32 %v969_v54 }
 0x759   :  { %v4301_v5 = vpop.eup %4300 }
 0x75a   :  { %v972_v11 = vmul.f32 %v4301_v5, %v4297_v46 }
 0x75e   :  { %v3767_v57 = vpop.f32.mrb[8].mxu1 }
 0x75f   :  { %v690_v60 = vpop.f32.mrb[9].mxu1  ;;  %v3803_v61 = vpop.f32.mrb[6].mxu0 }
 0x760   :  { %3770 = vmatprep.mubr.msk.f32.mxu1 %vm299_vm1, %v690_v60  ;;  %v1227_v62 = vpop.f32.mrb[7].mxu0  ;;  %v1233_v2 = vadd.f32 %v3803_v61, %v4673_v17  ;;  %v187_v60 = vld [vmem:[%s5161_s8 + $0x10] sm:$0xff]  ;;  %v188_v61 = vld [vmem:[%s5161_s8 + $0x18] sm:$0xff] }
 0x761   :  { %v1228_v1 = vadd.f32 %v1227_v62, %v4678_v18  ;;  %3771 = vmatmul.mubr.msk.f32.vlgmr.msra.gmra.mrb[10].mxu1 %vm299_vm1, %v3767_v57  ;;  %v4066_v62 = vpack.c.bf16 %v188_v61, %v187_v60 }
 0x762   :  { %3774 = vmatpush3.msra.mxu1 %v180_v51  ;;  %3775 = vmatprep.mubr.msk.f32.mxu1 %vm299_vm1, %v4724_v59  ;;  %v1239_v7 = vsel %vm389_vm3, %v1233_v2, -inf  ;;  %v4303_v8 = vpop.eup %4302  ;;  %v4239_v59 = vunpack.i.h.bf16 %v4237_v6 }
 0x763   :  { %4046 = vmatprep.subr.msk.bf16.mxu1 %vm4690_vm7, %v4044_v0  ;;  %v1236_v4 = vsel %vm385_vm4, %v1228_v1, -inf  ;;  %v973_v15 = vmul.f32 %v4303_v8, %v4299_v48  ;;  %v3464_v8 = vld [vmem:[%s5165_s12] ss:$0 sm:$0xff] }
 0x764   :  { %1237 = vmax.xlane.f32.xlu0 %v1236_v4  ;;  %v4056_v19 = vpack.c.bf16 %v4239_v59, %v4238_v13 }
 0x768   :  { %1240 = vmax.xlane.f32.xlu0 %v1239_v7 }
 0x769   :  { %3776 = vmatmul.mubr.msk.f32.vlgmr.msra.gmra.mrb[10].mxu1 %vm299_vm1, %v4722_v58 }
 0x76a   :  { %4049 = vmatpush3.bf16.msk.msra.mxu1 %vm4690_vm7, %v4044_v0  ;;  %3789 = vmatprep.mubr.msk.f32.mxu1 %vm385_vm4, %v972_v11 }
 0x76b   :  { %3792 = vmatprep.subr.mxu1 %v182_v12 }
 0x76d   :  { %3790 = vmatmul.mubr.msk.f32.vlgmr.msra.gmra.mrb[12].mxu1 %vm385_vm4, %v973_v15 }
 0x76e   :  { %3793 = vmatpush3.msra.mxu1 %v182_v12  ;;  %v3465_v12 = vld [vmem:[%s5166_s13] ss:$0 sm:$0xff] }
 0x76f   :  { %4058 = vmatprep.subr.msk.bf16.mxu1 %vm4690_vm7, %v4056_v19 }
 0x7f1   :  { %v1238_v20 = vpop.xlane.xlu0 %1237 }
 0x7f2   :  { %v1242_v21 = vsub.f32 %v1228_v1, %v1238_v20 }
 0x7f4   :  { %v1244_v22 = vmul.f32 1.442695, %v1242_v21 }
 0x7f5   :  { %v1241_v23 = vpop.xlane.xlu0 %1240 }
 0x7f6   :  { %4304 = vpow2.f32 %v1244_v22  ;;  %v1243_v58 = vsub.f32 %v1233_v2, %v1241_v23  ;;  %v190_v22 = vld [vmem:[%s5163_s10] sm:$0xff]  ;;  %v191_v23 = vld [vmem:[%s5163_s10 + $0x8] sm:$0xff] }
 0x7f8   :  { %v1246_v24 = vmul.f32 1.442695, %v1243_v58  ;;  %v4070_v58 = vpack.c.bf16 %v191_v23, %v190_v22 }
 0x7fa   :  { %4306 = vpow2.f32 %v1246_v24  ;;  %v192_v24 = vld [vmem:[%s5163_s10 + $0x10] sm:$0xff] }
 0x800   :  { %v4305_v25 = vpop.eup %4304 }
 0x801   :  { %v1248_v10 = vsel %vm385_vm4, %v4305_v25, 0.0 }
 0x802   :  { %1249 = vadd.xlane.f32.xlu0 %v1248_v10 }
 0x804   :  { %v4307_v16 = vpop.eup %4306 }
 0x805   :  { %v1251_v26 = vsel %vm389_vm3, %v4307_v16, 0.0 }
 0x806   :  { %1252 = vadd.xlane.f32.xlu0 %v1251_v26  ;;  %v195_v26 = vld [vmem:[%s5163_s10 + $0x28] sm:$0xff] }
 0x840   :  { %v3791_v27 = vpop.f32.mrb[12].mxu1 }
 0x841   :  { %v1053_v28 = vpop.f32.mrb[13].mxu1 }
 0x842   :  { %3794 = vmatprep.mubr.msk.f32.mxu1 %vm299_vm1, %v1053_v28  ;;  %v196_v28 = vld [vmem:[%s5163_s10 + $0x30] sm:$0xff] }
 0x843   :  { %3795 = vmatmul.mubr.msk.f32.vlgmr.msra.gmra.mrb[10].mxu1 %vm299_vm1, %v3791_v27 }
 0x844   :  { %4061 = vmatpush3.bf16.msk.msra.mxu1 %vm4690_vm7, %v4056_v19 }
 0x845   :  { %3811 = vmatprep.subr.mxu1 %v183_v29 }
 0x88f   :  { %v1250_v30 = vpop.xlane.xlu0 %1249 }
 0x890   :  { %4308 = vrcp.f32 %v1250_v30 }
 0x893   :  { %v1253_v31 = vpop.xlane.xlu0 %1252 }
 0x894   :  { %4310 = vrcp.f32 %v1253_v31  ;;  %v3466_v31 = vld [vmem:[%s5162_s9] ss:$0 sm:$0xff] }
 0x89a   :  { %v4309_v32 = vpop.eup %4308 }
 0x89b   :  { %v1256_v33 = vmul.f32 %v4309_v32, %v4305_v25  ;;  %v193_v25 = vld [vmem:[%s5163_s10 + $0x18] sm:$0xff] }
 0x89c   :  { %v4074_v10 = vpack.c.bf16 %v193_v25, %v192_v24 }
 0x89d   :  { %3808 = vmatprep.mubr.msk.f32.mxu1 %vm385_vm4, %v1256_v33 }
 0x89e   :  { %v4311_v35 = vpop.eup %4310 }
 0x89f   :  { %v1257_v9 = vmul.f32 %v4311_v35, %v4307_v16  ;;  %v194_v16 = vld [vmem:[%s5163_s10 + $0x20] sm:$0xff] }
 0x8a0   :  { %v4078_v27 = vpack.c.bf16 %v195_v26, %v194_v16 }
 0x8a1   :  { %3809 = vmatmul.mubr.msk.f32.vlgmr.msra.gmra.mrb[14].mxu1 %vm385_vm4, %v1257_v9 }
 0x8a2   :  { %3812 = vmatpush3.msra.mxu1 %v183_v29  ;;  %v197_v29 = vld [vmem:[%s5163_s10 + $0x38] sm:$0xff] }
 0x8a3   :  { %4071 = vmatprep.subr.bf16.mxu1 %v4070_v58  ;;  %v4082_v30 = vpack.c.bf16 %v197_v29, %v196_v28  ;;  %v3469_v28 = vld [vmem:[%s5164_s11] ss:$0 sm:$0xff] }
 0x974   :  { %v3810_v36 = vpop.f32.mrb[14].mxu1 }
 0x975   :  { %v1337_v37 = vpop.f32.mrb[15].mxu1 }
 0x976   :  { %3813 = vmatprep.mubr.msk.f32.mxu1 %vm299_vm1, %v1337_v37 }
 0x977   :  { %3814 = vmatmul.mubr.msk.f32.vlgmr.msra.gmra.mrb[10].mxu1 %vm299_vm1, %v3810_v36 }
 0x978   :  { %4073 = vmatpush3.bf16.msra.mxu1 %v4070_v58 }
 0x979   :  { %4075 = vmatprep.subr.bf16.mxu1 %v4074_v10 }
 0x97c   :  { %4077 = vmatpush3.bf16.msra.mxu1 %v4074_v10 }
 0x97d   :  { %4079 = vmatprep.subr.bf16.mxu1 %v4078_v27 }
 0x980   :  { %4081 = vmatpush3.bf16.msra.mxu1 %v4078_v27 }
 0x981   :  { %4083 = vmatprep.subr.bf16.mxu1 %v4082_v30 }
 0x984   :  { %4085 = vmatpush3.bf16.msra.mxu1 %v4082_v30 }
 0xa4a   :  { %v3815_v39 = vpop.f32.mrb[10].mxu1 }
 0xa4b   :  { %v1436_v40 = vadd.f32 %v3815_v39, %v3463_v38  ;;  %v1418_v41 = vpop.f32.mrb[11].mxu1 }
 0xa4c   :  { %v1435_v42 = vadd.f32 %v3463_v38, %v1418_v41 }
 0xa4d   :  { %v1438_v43 = vadd.f32 %v1436_v40, %v4641_v3 }
 0xa4e   :  { %v1437_v44 = vadd.f32 %v1435_v42, %v4634_v63  ;;  %v185_v63 = vld [vmem:[%s5161_s8] sm:$0xff] }
 0xa4f   :  { %v1443_v45 = vsel %vm1442_vm8, %v1438_v43, 0.0  ;;  %v4062_v57 = vpack.c.bf16 %v186_v56, %v185_v63 }
 0xa50   :  { %1444 = vadd.xlane.f32.xlu1 %v1443_v45  ;;  %v1439_v46 = vsel %vm209_vm0, %v1437_v44, 0.0 }
 0xa51   :  { %1440 = vadd.xlane.f32.xlu0 %v1439_v46  ;;  %4063 = vmatprep.subr.bf16.mxu0 %v4062_v57 }
 0xa52   :  { %4065 = vmatpush3.bf16.msra.mxu0 %v4062_v57 }
 0xa53   :  { %4067 = vmatprep.subr.bf16.mxu0 %v4066_v62 }
 0xa56   :  { %4069 = vmatpush3.bf16.msra.mxu0 %v4066_v62 }
 0xadd   :  { %v1445_v47 = vpop.xlane.xlu1 %1444 }
 0xade   :  { %v1448_v48 = vmul.f32 0.03125, %v1445_v47  ;;  %v1441_v49 = vpop.xlane.xlu0 %1440 }
 0xadf   :  { %v1447_v50 = vmul.f32 0.03125, %v1441_v49 }
 0xae0   :  { %v1450_v51 = vsub.f32 %v1438_v43, %v1448_v48 }
 0xae1   :  { %v1449_v52 = vsub.f32 %v1437_v44, %v1447_v50 }
 0xae2   :  { %v1452_v55 = vmul.f32 %v1450_v51, %v1450_v51 }
 0xae3   :  { %v1451_v53 = vmul.f32 %v1449_v52, %v1449_v52 }
 0xae4   :  { %v1456_v3 = vsel %vm1442_vm8, %v1452_v55, 0.0 }
 0xae5   :  { %v1453_v54 = vsel %vm209_vm0, %v1451_v53, 0.0 }
 0xae6   :  { %1454 = vadd.xlane.f32.xlu0 %v1453_v54 }
 0xaea   :  { %1457 = vadd.xlane.f32.xlu0 %v1456_v3 }
 0xb73   :  { %v1455_v0 = vpop.xlane.xlu0 %1454 }
 0xb74   :  { %v1459_v1 = vmul.f32 0.03125, %v1455_v0 }
 0xb76   :  { %v1461_v2 = vadd.f32 1e-05, %v1459_v1 }
 0xb77   :  { %v1458_v4 = vpop.xlane.xlu0 %1457 }
 0xb78   :  { %4312 = vrsqrt.f32 %v1461_v2  ;;  %v1460_v5 = vmul.f32 0.03125, %v1458_v4 }
 0xb7a   :  { %v1462_v6 = vadd.f32 1e-05, %v1460_v5 }
 0xb7c   :  { %4314 = vrsqrt.f32 %v1462_v6 }
 0xb82   :  { %v4313_v7 = vpop.eup %4312 }
 0xb83   :  { %v1465_v11 = vmul.f32 %v4313_v7, %v1449_v52 }
 0xb85   :  { %v1473_v59 = vmul.f32 %v3464_v8, %v1465_v11 }
 0xb86   :  { %v4315_v13 = vpop.eup %4314 }
 0xb87   :  { %v1466_v15 = vmul.f32 %v4315_v13, %v1450_v51  ;;  %v4829_v19 = vadd.f32 %v3465_v12, %v1473_v59 }
 0xb89   :  { %v1474_v20 = vmul.f32 %v3464_v8, %v1466_v15  ;;  %3824 = vmatprep.mubr.msk.f32.mxu0 %vm209_vm0, %v4829_v19 }
 0xb8b   :  { %v4833_v21 = vadd.f32 %v3465_v12, %v1474_v20 }
 0xb8d   :  { %3825 = vmatmul.mubr.msk.f32.vlgmr.msra.gmra.mrb[8].mxu0 %vm209_vm0, %v4833_v21 }
 0xc60   :  { %v3826_v32 = vpop.f32.mrb[8].mxu0 }
 0xc61   :  { %v1567_v33 = vadd.f32 %v3826_v32, %v3466_v31  ;;  %v1561_v35 = vpop.f32.mrb[9].mxu0 }
 0xc62   :  { %v1562_v9 = vadd.f32 %v3466_v31, %v1561_v35 }
 0xc63   :  { %v1573_v36 = vmul.f32 0.70710677, %v1567_v33  ;;  %v1571_v16 = vmul.f32 0.5, %v1567_v33 }
 0xc64   :  { %v1572_v37 = vmul.f32 0.70710677, %v1562_v9  ;;  %v1570_v25 = vmul.f32 0.5, %v1562_v9 }
 0xc65   :  { %v1575_v38 = vand.u32 2147483647, %v1573_v36  ;;  %vm1615_vm9 = vcmp.ge.f32.partialorder %v1573_v36, 0.0 }
 0xc66   :  { %v1574_v39 = vand.u32 2147483647, %v1572_v37  ;;  %vm1614_vm10 = vcmp.ge.f32.partialorder %v1572_v37, 0.0 }
 0xc67   :  { %v1577_v40 = vmul.f32 0.3275911, %v1575_v38  ;;  %v1603_v44 = vsub.f32 0.0, %v1575_v38 }
 0xc68   :  { %v1576_v41 = vmul.f32 0.3275911, %v1574_v39  ;;  %v1602_v45 = vsub.f32 0.0, %v1574_v39 }
 0xc69   :  { %v1579_v42 = vadd.f32 1.0, %v1577_v40  ;;  %v1605_v47 = vmul.f32 %v1603_v44, %v1575_v38 }
 0xc6a   :  { %v1578_v43 = vadd.f32 1.0, %v1576_v41  ;;  %v1604_v50 = vmul.f32 %v1602_v45, %v1574_v39 }
 0xc6b   :  { %4316 = vrcp.f32 %v1579_v42  ;;  %v1608_v53 = vmul.f32 1.442695, %v1605_v47 }
 0xc6c   :  { %4318 = vrcp.f32 %v1578_v43  ;;  %v1606_v3 = vmul.f32 1.442695, %v1604_v50 }
 0xc6d   :  { %4320 = vpow2.f32 %v1608_v53 }
 0xc6e   :  { %4322 = vpow2.f32 %v1606_v3 }
 0xc75   :  { %v4317_v46 = vpop.eup %4316 }
 0xc76   :  { %v4319_v48 = vpop.eup %4318  ;;  %v1585_v49 = vmul.f32 1.0614054, %v4317_v46 }
 0xc77   :  { %v1584_v51 = vmul.f32 1.0614054, %v4319_v48  ;;  %v4321_v7 = vpop.eup %4320 }
 0xc78   :  { %v1587_v52 = vadd.f32 -1.4531521, %v1585_v49  ;;  %v4323_v11 = vpop.eup %4322  ;;  %v3477_v49 = vld [vmem:[%s5157_s4 + $0x38] sm:$0xff] }
 0xc79   :  { %v1586_v54 = vadd.f32 -1.4531521, %v1584_v51 }
 0xc7a   :  { %v1589_v55 = vmul.f32 %v4317_v46, %v1587_v52 }
 0xc7b   :  { %v1588_v63 = vmul.f32 %v4319_v48, %v1586_v54 }
 0xc7c   :  { %v1591_v56 = vadd.f32 1.4214138, %v1589_v55 }
 0xc7d   :  { %v1590_v57 = vadd.f32 1.4214138, %v1588_v63 }
 0xc7e   :  { %v1593_v60 = vmul.f32 %v4317_v46, %v1591_v56  ;;  %v3472_v56 = vld [vmem:[%s5167_s14] ss:$0 sm:$0xff] }
 0xc7f   :  { %v1592_v61 = vmul.f32 %v4319_v48, %v1590_v57 }
 0xc80   :  { %v1595_v62 = vadd.f32 -0.28449672, %v1593_v60  ;;  %v3473_v60 = vld [vmem:[%s5168_s15] ss:$0 sm:$0xff] }
 0xc81   :  { %v1594_v0 = vadd.f32 -0.28449672, %v1592_v61 }
 0xc82   :  { %v1597_v1 = vmul.f32 %v4317_v46, %v1595_v62 }
 0xc83   :  { %v1596_v2 = vmul.f32 %v4319_v48, %v1594_v0 }
 0xc84   :  { %v1599_v4 = vadd.f32 0.2548296, %v1597_v1 }
 0xc85   :  { %v1598_v5 = vadd.f32 0.2548296, %v1596_v2 }
 0xc86   :  { %v1601_v6 = vmul.f32 %v4317_v46, %v1599_v4  ;;  %v3475_v46 = vld [vmem:[%s5157_s4 + $0x28] sm:$0xff] }
 0xc87   :  { %v1600_v8 = vmul.f32 %v4319_v48, %v1598_v5  ;;  %v3476_v48 = vld [vmem:[%s5157_s4 + $0x30] sm:$0xff]  ;;  %v3502_v5 = vld [vmem:[%s5158_s5 + $0x1] ss:$0 sm:$0xff] }
 0xc88   :  { %v1611_v12 = vmul.f32 %v4321_v7, %v1601_v6  ;;  %v4090_v50 = vpack.c.bf16 %v3477_v49, %v3476_v48 }
 0xc89   :  { %v1610_v59 = vmul.f32 %v4323_v11, %v1600_v8 }
 0xc8a   :  { %v1613_v13 = vsub.f32 1.0, %v1611_v12 }
 0xc8b   :  { %v1612_v15 = vsub.f32 1.0, %v1610_v59 }
 0xc8c   :  { %v1617_v20 = vsub.f32 0.0, %v1613_v13 }
 0xc8d   :  { %v1616_v22 = vsub.f32 0.0, %v1612_v15 }
 0xc8e   :  { %v1619_v23 = vsel %vm1615_vm9, %v1613_v13, %v1617_v20 }
 0xc8f   :  { %v1621_v58 = vadd.f32 1.0, %v1619_v23  ;;  %v1618_v24 = vsel %vm1614_vm10, %v1612_v15, %v1616_v22 }
 0xc90   :  { %v1620_v10 = vadd.f32 1.0, %v1618_v24 }
 0xc91   :  { %v1623_v27 = vmul.f32 %v1621_v58, %v1571_v16 }
 0xc92   :  { %v1622_v26 = vmul.f32 %v1620_v10, %v1570_v25 }
 0xc94   :  { %3843 = vmatprep.mubr.msk.f32.mxu1 %vm1630_vm11, %v1622_v26 }
 0xc95   :  { %3844 = vmatmul.mubr.msk.f32.vlgmr.msra.gmra.mrb[16].mxu1 %vm1630_vm11, %v1623_v27 }
 0xd68   :  { %v3845_v29 = vpop.f32.mrb[16].mxu1 }
 0xd69   :  { %v1703_v30 = vpop.f32.mrb[17].mxu1  ;;  %v1709_v31 = vadd.f32 %v3845_v29, %v3469_v28 }
 0xd6a   :  { %v1704_v32 = vadd.f32 %v3469_v28, %v1703_v30 }
 0xd6b   :  { %v1713_v33 = vadd.f32 %v1709_v31, %v4833_v21  ;;  %v3474_v21 = vld [vmem:[%s5157_s4 + $0x20] sm:$0xff] }
 0xd6c   :  { %v1712_v35 = vadd.f32 %v1704_v32, %v4829_v19  ;;  %v4086_v47 = vpack.c.bf16 %v3475_v46, %v3474_v21 }
 0xd6d   :  { %v1717_v36 = vsel %vm1442_vm8, %v1713_v33, 0.0 }
 0xd6e   :  { %v1714_v9 = vsel %vm209_vm0, %v1712_v35, 0.0  ;;  %4087 = vmatprep.subr.bf16.mxu0 %v4086_v47 }
 0xd6f   :  { %1715 = vadd.xlane.f32.xlu0 %v1714_v9  ;;  %4089 = vmatpush3.bf16.msra.mxu0 %v4086_v47 }
 0xd70   :  { %4091 = vmatprep.subr.bf16.mxu0 %v4090_v50 }
 0xd73   :  { %1718 = vadd.xlane.f32.xlu0 %v1717_v36  ;;  %4093 = vmatpush3.bf16.msra.mxu0 %v4090_v50 }
 0xdfc   :  { %v1716_v37 = vpop.xlane.xlu0 %1715 }
 0xdfd   :  { %v1720_v38 = vmul.f32 0.03125, %v1716_v37 }
 0xdff   :  { %v1722_v39 = vsub.f32 %v1712_v35, %v1720_v38 }
 0xe00   :  { %v1719_v40 = vpop.xlane.xlu0 %1718 }
 0xe01   :  { %v1721_v41 = vmul.f32 0.03125, %v1719_v40  ;;  %v1724_v42 = vmul.f32 %v1722_v39, %v1722_v39 }
 0xe03   :  { %v1723_v43 = vsub.f32 %v1713_v33, %v1721_v41  ;;  %v1726_v44 = vsel %vm209_vm0, %v1724_v42, 0.0 }
 0xe04   :  { %1727 = vadd.xlane.f32.xlu0 %v1726_v44 }
 0xe05   :  { %v1725_v45 = vmul.f32 %v1723_v43, %v1723_v43 }
 0xe07   :  { %v1729_v19 = vsel %vm1442_vm8, %v1725_v45, 0.0 }
 0xe08   :  { %1730 = vadd.xlane.f32.xlu0 %v1729_v19 }
 0xe91   :  { %v1728_v51 = vpop.xlane.xlu0 %1727 }
 0xe92   :  { %v1732_v52 = vmul.f32 0.03125, %v1728_v51 }
 0xe94   :  { %v1734_v53 = vadd.f32 1e-05, %v1732_v52 }
 0xe95   :  { %v1731_v54 = vpop.xlane.xlu0 %1730 }
 0xe96   :  { %4324 = vrsqrt.f32 %v1734_v53  ;;  %v1733_v55 = vmul.f32 0.03125, %v1731_v54 }
 0xe98   :  { %v1735_v3 = vadd.f32 1e-05, %v1733_v55 }
 0xe9a   :  { %4326 = vrsqrt.f32 %v1735_v3 }
 0xea0   :  { %v4325_v63 = vpop.eup %4324 }
 0xea1   :  { %v1738_v57 = vmul.f32 %v4325_v63, %v1722_v39 }
 0xea3   :  { %v1746_v61 = vmul.f32 %v3472_v56, %v1738_v57 }
 0xea4   :  { %v4327_v62 = vpop.eup %4326 }
 0xea5   :  { %v1739_v0 = vmul.f32 %v4327_v62, %v1723_v43  ;;  %v4893_v1 = vadd.f32 %v3473_v60, %v1746_v61  ;;  %v4971_v61 = vld [vmem:[%s5187_s28] sm:$0xff] }
 0xea7   :  { %v1747_v2 = vmul.f32 %v3472_v56, %v1739_v0  ;;  %3854 = vmatprep.mubr.msk.f32.mxu0 %vm209_vm0, %v4893_v1  ;;  %v4965_v56 = vld [vmem:[%s5187_s28 + $0x8] sm:$0x3]  ;;  %s5190_s28 = smov 56  }
 0xea9   :  { %v4897_v4 = vadd.f32 %v3473_v60, %v1747_v2 }
 0xeab   :  { %3855 = vmatmul.mubr.msk.f32.vlgmr.msra.gmra.mrb[10].mxu0 %vm209_vm0, %v4897_v4 }
 0xf7e   :  { %v3856_v6 = vpop.f32.mrb[10].mxu0 }
 0xf7f   :  { %v1880_v7 = vadd.f32 %v3856_v6, %v3502_v5  ;;  %v1874_v8 = vpop.f32.mrb[11].mxu0 }
 0xf80   :  { %v1875_v11 = vadd.f32 %v3502_v5, %v1874_v8 }
 0xf81   :  { %v4916_v23 = vmul.f32 0.35355338, %v1880_v7 }
 0xf82   :  { %v4904_v12 = vpack.i.bf16 %v1880_v7, %v1875_v11  ;;  %v4906_v59 = vmul.f32 0.35355338, %v1875_v11 }
 0xf84   :  { %4241 = vrot.lane.b32.xlu0 %v4904_v12, %s4400_s26  ;;  %3861 = vmatprep.mubr.msk.f32.mxu0 %vm299_vm1, %v4906_v59 }
 0xff6   :  { %v4242_v13 = vpop.permute.xlu0 %4241 }
 0xff7   :  { %v4244_v15 = vunpack.i.h.bf16 %v4242_v13  ;;  %v4243_v20 = vunpack.i.l.bf16 %v4242_v13 }
 0xff9   :  { %v4094_v22 = vpack.c.bf16 %v4244_v15, %v4243_v20 }
 0xffb   :  { %4096 = vmatprep.subr.msk.bf16.mxu0 %vm4658_vm2, %v4094_v22 }
 0xffc   :  { %4099 = vmatpush3.bf16.xpose.msk.msra.mxu0 %vm4658_vm2, %v4094_v22 }
0x1003   :  { %3862 = vmatmul.mubr.msk.f32.vlgmr.msra.gmra.mrb[12].mxu0 %vm299_vm1, %v4916_v23 }
0x10d6   :  { %v3863_v58 = vpop.f32.mrb[12].mxu0 }
0x10d7   :  { %v1967_v24 = vpop.f32.mrb[13].mxu0  ;;  %v1973_v10 = vadd.f32 %v3863_v58, %v4673_v17 }
0x10d8   :  { %v1968_v25 = vadd.f32 %v1967_v24, %v4678_v18 }
0x10d9   :  { %v1979_v26 = vsel %vm389_vm3, %v1973_v10, -inf }
0x10da   :  { %v1976_v16 = vsel %vm385_vm4, %v1968_v25, -inf }
0x10db   :  { %1977 = vmax.xlane.f32.xlu1 %v1976_v16 }
0x10df   :  { %1980 = vmax.xlane.f32.xlu1 %v1979_v26 }
0x10f0   :  { %4246 = vrot.lane.b32.xlu1 %v4904_v12, %s4401_s0 }
0x10f4   :  { %4251 = vrot.lane.b32.xlu1 %v4904_v12, %s4402_s19 }
0x10f8   :  { %2086 = vrot.lane.b32.xlu1 %v4906_v59, %s4403_s1 }
0x1168   :  { %v1978_v27 = vpop.xlane.xlu1 %1977 }
0x1169   :  { %v1982_v28 = vsub.f32 %v1968_v25, %v1978_v27 }
0x116b   :  { %v1984_v18 = vmul.f32 1.442695, %v1982_v28 }
0x116c   :  { %v1981_v29 = vpop.xlane.xlu1 %1980 }
0x116d   :  { %4328 = vpow2.f32 %v1984_v18  ;;  %v1983_v17 = vsub.f32 %v1973_v10, %v1981_v29 }
0x116f   :  { %v1986_v30 = vmul.f32 1.442695, %v1983_v17 }
0x1170   :  { %v4247_v31 = vpop.permute.xlu1 %4246 }
0x1171   :  { %4330 = vpow2.f32 %v1986_v30  ;;  %v4249_v32 = vunpack.i.h.bf16 %v4247_v31  ;;  %v4248_v35 = vunpack.i.l.bf16 %v4247_v31 }
0x1173   :  { %v4100_v9 = vpack.c.bf16 %v4249_v32, %v4248_v35 }
0x1174   :  { %v4252_v33 = vpop.permute.xlu1 %4251 }
0x1175   :  { %v4254_v36 = vunpack.i.h.bf16 %v4252_v33  ;;  %v4253_v37 = vunpack.i.l.bf16 %v4252_v33  ;;  %4102 = vmatprep.subr.msk.bf16.mxu1 %vm4690_vm7, %v4100_v9 }
0x1176   :  { %4105 = vmatpush3.bf16.msk.msra.mxu1 %vm4690_vm7, %v4100_v9 }
0x1177   :  { %v4329_v38 = vpop.eup %4328  ;;  %v4106_v39 = vpack.c.bf16 %v4254_v36, %v4253_v37 }
0x1178   :  { %v1988_v40 = vsel %vm385_vm4, %v4329_v38, 0.0  ;;  %v2087_v43 = vpop.permute.xlu1 %2086 }
0x1179   :  { %1989 = vadd.xlane.f32.xlu1 %v1988_v40  ;;  %4108 = vmatprep.subr.msk.bf16.mxu1 %vm4658_vm2, %v4106_v39 }
0x117b   :  { %v4331_v41 = vpop.eup %4330 }
0x117c   :  { %v1991_v42 = vsel %vm389_vm3, %v4331_v41, 0.0 }
0x117d   :  { %1992 = vadd.xlane.f32.xlu0 %v1991_v42 }
0x118a   :  { %2088 = vrot.lane.b32.xlu1 %v4916_v23, %s4403_s1  ;;  %s5191_s1 = smov 104  }
0x118e   :  { %4256 = vrot.lane.b32.xlu1 %v4904_v12, %s4405_s21  ;;  %s5192_s21 = smov 48  }
0x1192   :  { %2451 = vrot.lane.b32.xlu1 %v4916_v23, %s4406_s20 }
0x1193   :  { %2449 = vrot.lane.b32.xlu0 %v4906_v59, %s4406_s20  ;;  %s5193_s20 = smov 40  }
0x1206   :  { %v1990_v44 = vpop.xlane.xlu1 %1989 }
0x1207   :  { %4332 = vrcp.f32 %v1990_v44 }
0x120a   :  { %v1993_v45 = vpop.xlane.xlu0 %1992  ;;  %v2089_v19 = vpop.permute.xlu1 %2088 }
0x120b   :  { %4334 = vrcp.f32 %v1993_v45 }
0x120e   :  { %v4257_v46 = vpop.permute.xlu1 %4256  ;;  %v2450_v53 = vpop.permute.xlu0 %2449 }
0x120f   :  { %v4259_v48 = vunpack.i.h.bf16 %v4257_v46  ;;  %v4258_v49 = vunpack.i.l.bf16 %v4257_v46  ;;  %v3480_v46 = vld [vmem:[%s5159_s6 + $0x28] sm:$0xff] }
0x1211   :  { %v4333_v21 = vpop.eup %4332  ;;  %v4118_v52 = vpack.c.bf16 %v4259_v48, %v4258_v49 }
0x1212   :  { %v1996_v47 = vmul.f32 %v4333_v21, %v4329_v38  ;;  %v2452_v54 = vpop.permute.xlu1 %2451 }
0x1214   :  { %3868 = vmatprep.mubr.msk.f32.mxu1 %vm385_vm4, %v1996_v47  ;;  %v3479_v47 = vld [vmem:[%s5159_s6 + $0x20] sm:$0xff] }
0x1215   :  { %v4335_v50 = vpop.eup %4334 }
0x1216   :  { %v1997_v51 = vmul.f32 %v4335_v50, %v4331_v41 }
0x1218   :  { %3869 = vmatmul.mubr.msk.f32.vlgmr.msra.gmra.mrb[18].mxu1 %vm385_vm4, %v1997_v51 }
0x1219   :  { %4111 = vmatpush3.bf16.xpose.msk.msra.mxu1 %vm4658_vm2, %v4106_v39  ;;  %3875 = vmatprep.mubr.msk.f32.mxu1 %vm299_vm1, %v2087_v43 }
0x121a   :  { %4120 = vmatprep.subr.msk.bf16.mxu1 %vm4658_vm2, %v4118_v52 }
0x1220   :  { %3876 = vmatmul.mubr.msk.f32.vlgmr.msra.gmra.mrb[20].mxu1 %vm299_vm1, %v2089_v19 }
0x1221   :  { %4123 = vmatpush3.bf16.xpose.msk.msra.mxu1 %vm4658_vm2, %v4118_v52  ;;  %3899 = vmatprep.mubr.msk.f32.mxu1 %vm299_vm1, %v2450_v53 }
0x1228   :  { %3900 = vmatmul.mubr.msk.f32.vlgmr.msra.gmra.mrb[22].mxu1 %vm299_vm1, %v2452_v54 }
0x12eb   :  { %v4958_v55 = vpop.f32.mrb[18].mxu1 }
0x12ec   :  { %v4960_v3 = vpop.f32.mrb[19].mxu1 }
0x12f3   :  { %v3877_v63 = vpop.f32.mrb[20].mxu1 }
0x12f4   :  { %v2174_v57 = vadd.f32 %v4965_v56, %v3877_v63  ;;  %v2168_v60 = vpop.f32.mrb[21].mxu1 }
0x12f5   :  { %v2169_v62 = vadd.f32 %v4971_v61, %v2168_v60 }
0x12f6   :  { %v2180_v0 = vsel %vm389_vm3, %v2174_v57, -inf }
0x12f7   :  { %2181 = vmax.xlane.f32.xlu0 %v2180_v0  ;;  %v2177_v2 = vsel %vm385_vm4, %v2169_v62, -inf }
0x12f8   :  { %2178 = vmax.xlane.f32.xlu1 %v2177_v2 }
0x12fb   :  { %v3901_v5 = vpop.f32.mrb[22].mxu1 }
0x12fc   :  { %v2531_v6 = vpop.f32.mrb[23].mxu1  ;;  %v2537_v32 = vadd.f32 %v4965_v56, %v3901_v5 }
0x12fd   :  { %v2532_v7 = vadd.f32 %v4971_v61, %v2531_v6 }
0x12fe   :  { %v2543_v35 = vsel %vm389_vm3, %v2537_v32, -inf }
0x12ff   :  { %v2540_v8 = vsel %vm385_vm4, %v2532_v7, -inf }
0x130d   :  { %4266 = vrot.lane.b32.xlu0 %v4904_v12, %s4408_s2 }
0x132c   :  { %2541 = vmax.xlane.f32.xlu0 %v2540_v8  ;;  %v3481_v8 = vld [vmem:[%s5159_s6 + $0x30] sm:$0xff] }
0x1384   :  { %v2182_v11 = vpop.xlane.xlu0 %2181 }
0x1385   :  { %v2184_v13 = vsub.f32 %v2174_v57, %v2182_v11  ;;  %v2179_v15 = vpop.xlane.xlu1 %2178 }
0x1386   :  { %v2183_v20 = vsub.f32 %v2169_v62, %v2179_v15 }
0x1387   :  { %v2187_v22 = vmul.f32 1.442695, %v2184_v13 }
0x1388   :  { %v2185_v58 = vmul.f32 1.442695, %v2183_v20  ;;  %v4267_v24 = vpop.permute.xlu0 %4266 }
0x1389   :  { %4336 = vpow2.f32 %v2187_v22  ;;  %v4269_v25 = vunpack.i.h.bf16 %v4267_v24  ;;  %v4268_v10 = vunpack.i.l.bf16 %v4267_v24 }
0x138a   :  { %4338 = vpow2.f32 %v2185_v58 }
0x138b   :  { %v4130_v16 = vpack.c.bf16 %v4269_v25, %v4268_v10 }
0x138d   :  { %4132 = vmatprep.subr.msk.bf16.mxu1 %vm4658_vm2, %v4130_v16 }
0x138e   :  { %4135 = vmatpush3.bf16.xpose.msk.msra.mxu1 %vm4658_vm2, %v4130_v16 }
0x1393   :  { %v4337_v26 = vpop.eup %4336 }
0x1394   :  { %v2192_v27 = vsel %vm389_vm3, %v4337_v26, 0.0  ;;  %v4339_v28 = vpop.eup %4338 }
0x1395   :  { %2193 = vadd.xlane.f32.xlu1 %v2192_v27  ;;  %v2189_v18 = vsel %vm385_vm4, %v4339_v28, 0.0 }
0x1399   :  { %2190 = vadd.xlane.f32.xlu1 %v2189_v18 }
0x13aa   :  { %4261 = vrot.lane.b32.xlu1 %v4904_v12, %s5190_s28 }
0x13ae   :  { %2733 = vrot.lane.b32.xlu1 %v4906_v59, %s5191_s1 }
0x13b2   :  { %2735 = vrot.lane.b32.xlu1 %v4916_v23, %s5191_s1 }
0x13b9   :  { %v2542_v29 = vpop.xlane.xlu0 %2541 }
0x13ba   :  { %v2546_v14 = vsub.f32 %v2532_v7, %v2542_v29  ;;  %v3482_v29 = vld [vmem:[%s5159_s6 + $0x38] sm:$0xff] }
0x13bc   :  { %v2548_v17 = vmul.f32 1.442695, %v2546_v14 }
0x13be   :  { %4340 = vpow2.f32 %v2548_v17 }
0x13c8   :  { %v4992_v30 = vpop.eup %4340 }
0x13c9   :  { %v2552_v31 = vsel %vm385_vm4, %v4992_v30, 0.0 }
0x13ca   :  { %2553 = vadd.xlane.f32.xlu0 %v2552_v31 }
0x13d6   :  { %2544 = vmax.xlane.f32.xlu1 %v2543_v35 }
0x13e7   :  { %4271 = vrot.lane.b32.xlu1 %v4904_v12, %s5192_s21 }
0x13eb   :  { %4276 = vrot.lane.b32.xlu1 %v4904_v12, %s5193_s20 }
0x1422   :  { %v2194_v59 = vpop.xlane.xlu1 %2193 }
0x1423   :  { %4342 = vrcp.f32 %v2194_v59 }
0x1426   :  { %v2191_v23 = vpop.xlane.xlu1 %2190 }
0x1427   :  { %4344 = vrcp.f32 %v2191_v23 }
0x142a   :  { %v4262_v9 = vpop.permute.xlu1 %4261 }
0x142b   :  { %v4264_v33 = vunpack.i.h.bf16 %v4262_v9  ;;  %v4263_v36 = vunpack.i.l.bf16 %v4262_v9 }
0x142d   :  { %v4112_v37 = vpack.c.bf16 %v4264_v33, %v4263_v36  ;;  %v4343_v39 = vpop.eup %4342 }
0x142e   :  { %v2734_v38 = vpop.permute.xlu1 %2733  ;;  %v2198_v42 = vmul.f32 %v4343_v39, %v4337_v26 }
0x142f   :  { %4114 = vmatprep.subr.msk.bf16.mxu0 %vm4690_vm7, %v4112_v37  ;;  %3918 = vmatprep.mubr.msk.f32.mxu1 %vm299_vm1, %v2734_v38 }
0x1430   :  { %4117 = vmatpush3.bf16.msk.msra.mxu0 %vm4690_vm7, %v4112_v37 }
0x1431   :  { %v4345_v40 = vpop.eup %4344  ;;  %3885 = vmatprep.subr.mxu0 %v3480_v46 }
0x1432   :  { %v2736_v12 = vpop.permute.xlu1 %2735  ;;  %v2197_v41 = vmul.f32 %v4345_v40, %v4339_v28 }
0x1433   :  { %3919 = vmatmul.mubr.msk.f32.vlgmr.msra.gmra.mrb[24].mxu1 %vm299_vm1, %v2736_v12 }
0x1434   :  { %3882 = vmatprep.mubr.msk.f32.mxu0 %vm385_vm4, %v2197_v41 }
0x1435   :  { %3883 = vmatmul.mubr.msk.f32.vlgmr.msra.gmra.mrb[14].mxu0 %vm385_vm4, %v2198_v42 }
0x1436   :  { %3886 = vmatpush3.msra.mxu0 %v3480_v46 }
0x1437   :  { %3890 = vmatprep.subr.mxu0 %v3479_v47 }
0x1457   :  { %v2554_v48 = vpop.xlane.xlu0 %2553 }
0x1463   :  { %v2545_v43 = vpop.xlane.xlu1 %2544 }
0x1464   :  { %v2547_v44 = vsub.f32 %v2537_v32, %v2545_v43 }
0x1466   :  { %v2550_v45 = vmul.f32 1.442695, %v2547_v44 }
0x1467   :  { %v4272_v49 = vpop.permute.xlu1 %4271 }
0x1468   :  { %4346 = vpow2.f32 %v2550_v45  ;;  %v4274_v52 = vunpack.i.h.bf16 %v4272_v49  ;;  %v4273_v53 = vunpack.i.l.bf16 %v4272_v49 }
0x1469   :  { %4348 = vrcp.f32 %v2554_v48  ;;  %v3485_v48 = vld [vmem:[%s5161_s8 + $0x28] sm:$0xff] }
0x146a   :  { %v4124_v2 = vpack.c.bf16 %v4274_v52, %v4273_v53 }
0x1472   :  { %v4347_v19 = vpop.eup %4346 }
0x1473   :  { %v2555_v21 = vsel %vm389_vm3, %v4347_v19, 0.0  ;;  %v4349_v5 = vpop.eup %4348 }
0x1474   :  { %2556 = vadd.xlane.f32.xlu0 %v2555_v21  ;;  %v2560_v7 = vmul.f32 %v4349_v5, %v4992_v30  ;;  %v3543_v5 = vld [vmem:[%s5166_s13 + $0x1] ss:$0 sm:$0xff] }
0x1501   :  { %v2557_v50 = vpop.xlane.xlu0 %2556 }
0x1502   :  { %4350 = vrcp.f32 %v2557_v50  ;;  %v3486_v50 = vld [vmem:[%s5161_s8 + $0x30] sm:$0xff] }
0x1506   :  { %v3920_v51 = vpop.f32.mrb[24].mxu1 }
0x1507   :  { %v2815_v54 = vpop.f32.mrb[25].mxu1  ;;  %v2821_v62 = vadd.f32 %v4965_v56, %v3920_v51  ;;  %v4277_v56 = vpop.permute.xlu1 %4276  ;;  %v3487_v51 = vld [vmem:[%s5161_s8 + $0x38] sm:$0xff] }
0x1508   :  { %v2816_v63 = vadd.f32 %v4971_v61, %v2815_v54  ;;  %v3884_v57 = vpop.f32.mrb[14].mxu0  ;;  %v4279_v11 = vunpack.i.h.bf16 %v4277_v56  ;;  %v4278_v13 = vunpack.i.l.bf16 %v4277_v56  ;;  %v4146_v52 = vpack.c.bf16 %v3487_v51, %v3486_v50 }
0x1509   :  { %v2278_v60 = vpop.f32.mrb[15].mxu0  ;;  %v2827_v61 = vsel %vm389_vm3, %v2821_v62, -inf }
0x150a   :  { %3887 = vmatprep.mubr.msk.f32.mxu0 %vm299_vm1, %v2278_v60  ;;  %v2824_v0 = vsel %vm385_vm4, %v2816_v63, -inf  ;;  %v4136_v15 = vpack.c.bf16 %v4279_v11, %v4278_v13 }
0x150b   :  { %2825 = vmax.xlane.f32.xlu0 %v2824_v0  ;;  %3888 = vmatmul.mubr.msk.f32.vlgmr.msra.gmra.mrb[16].mxu0 %vm299_vm1, %v3884_v57 }
0x150c   :  { %3891 = vmatpush3.msra.mxu0 %v3479_v47  ;;  %3892 = vmatprep.mubr.msk.f32.mxu0 %vm299_vm1, %v4960_v3  ;;  %v4351_v6 = vpop.eup %4350 }
0x150d   :  { %4126 = vmatprep.subr.msk.bf16.mxu0 %vm4690_vm7, %v4124_v2  ;;  %v2561_v3 = vmul.f32 %v4351_v6, %v4347_v19 }
0x150f   :  { %2828 = vmax.xlane.f32.xlu0 %v2827_v61 }
0x1513   :  { %3893 = vmatmul.mubr.msk.f32.vlgmr.msra.gmra.mrb[16].mxu0 %vm299_vm1, %v4958_v55 }
0x1514   :  { %4129 = vmatpush3.bf16.msk.msra.mxu0 %vm4690_vm7, %v4124_v2  ;;  %3906 = vmatprep.mubr.msk.f32.mxu0 %vm385_vm4, %v2560_v7  ;;  %v3542_v2 = vld [vmem:[%s5165_s12 + $0x1] ss:$0 sm:$0xff] }
0x1515   :  { %3909 = vmatprep.subr.mxu0 %v3481_v8 }
0x1517   :  { %3907 = vmatmul.mubr.msk.f32.vlgmr.msra.gmra.mrb[18].mxu0 %vm385_vm4, %v2561_v3  ;;  %v3489_v3 = vld [vmem:[%s5163_s10 + $0x40] sm:$0xff] }
0x1518   :  { %3910 = vmatpush3.msra.mxu0 %v3481_v8 }
0x1519   :  { %4138 = vmatprep.subr.msk.bf16.mxu0 %vm4690_vm7, %v4136_v15 }
0x1598   :  { %v2826_v20 = vpop.xlane.xlu0 %2825 }
0x1599   :  { %v2830_v22 = vsub.f32 %v2816_v63, %v2826_v20 }
0x159b   :  { %v2832_v58 = vmul.f32 1.442695, %v2830_v22  ;;  %v3491_v22 = vld [vmem:[%s5163_s10 + $0x50] sm:$0xff] }
0x159c   :  { %v2829_v24 = vpop.xlane.xlu0 %2828 }
0x159d   :  { %4352 = vpow2.f32 %v2832_v58  ;;  %v2831_v55 = vsub.f32 %v2821_v62, %v2829_v24  ;;  %v3492_v58 = vld [vmem:[%s5163_s10 + $0x58] sm:$0xff] }
0x159e   :  { %v4154_v24 = vpack.c.bf16 %v3492_v58, %v3491_v22  ;;  %v3547_v58 = vld [vmem:[%s5164_s11 + $0x1] ss:$0 sm:$0xff] }
0x159f   :  { %v2834_v25 = vmul.f32 1.442695, %v2831_v55  ;;  %v3493_v55 = vld [vmem:[%s5163_s10 + $0x60] sm:$0xff] }
0x15a1   :  { %4354 = vpow2.f32 %v2834_v25  ;;  %v3494_v25 = vld [vmem:[%s5163_s10 + $0x68] sm:$0xff] }
0x15a7   :  { %v4353_v10 = vpop.eup %4352 }
0x15a8   :  { %v2836_v16 = vsel %vm385_vm4, %v4353_v10, 0.0 }
0x15a9   :  { %2837 = vadd.xlane.f32.xlu0 %v2836_v16  ;;  %v3495_v16 = vld [vmem:[%s5163_s10 + $0x70] sm:$0xff] }
0x15ab   :  { %v4355_v26 = vpop.eup %4354 }
0x15ac   :  { %v2839_v27 = vsel %vm389_vm3, %v4355_v26, 0.0 }
0x15ad   :  { %2840 = vadd.xlane.f32.xlu0 %v2839_v27 }
0x15ea   :  { %v3908_v28 = vpop.f32.mrb[18].mxu0 }
0x15eb   :  { %v2641_v18 = vpop.f32.mrb[19].mxu0 }
0x15ec   :  { %3911 = vmatprep.mubr.msk.f32.mxu0 %vm299_vm1, %v2641_v18 }
0x15ed   :  { %3912 = vmatmul.mubr.msk.f32.vlgmr.msra.gmra.mrb[16].mxu0 %vm299_vm1, %v3908_v28  ;;  %v3544_v28 = vld [vmem:[%s5162_s9 + $0x1] ss:$0 sm:$0xff] }
0x15ee   :  { %4141 = vmatpush3.bf16.msk.msra.mxu0 %vm4690_vm7, %v4136_v15  ;;  %v3490_v15 = vld [vmem:[%s5163_s10 + $0x48] sm:$0xff] }
0x15ef   :  { %3928 = vmatprep.subr.mxu0 %v3482_v29  ;;  %v4150_v20 = vpack.c.bf16 %v3490_v15, %v3489_v3 }
0x1636   :  { %v2838_v14 = vpop.xlane.xlu0 %2837 }
0x1637   :  { %4356 = vrcp.f32 %v2838_v14 }
0x163a   :  { %v2841_v17 = vpop.xlane.xlu0 %2840 }
0x163b   :  { %4358 = vrcp.f32 %v2841_v17 }
0x1641   :  { %v4357_v30 = vpop.eup %4356 }
0x1642   :  { %v2844_v31 = vmul.f32 %v4357_v30, %v4353_v10  ;;  %v4158_v10 = vpack.c.bf16 %v3494_v25, %v3493_v55 }
0x1644   :  { %3925 = vmatprep.mubr.msk.f32.mxu0 %vm385_vm4, %v2844_v31 }
0x1645   :  { %v4359_v32 = vpop.eup %4358 }
0x1646   :  { %v2845_v35 = vmul.f32 %v4359_v32, %v4355_v26  ;;  %v3496_v26 = vld [vmem:[%s5163_s10 + $0x78] sm:$0xff] }
0x1647   :  { %v4162_v27 = vpack.c.bf16 %v3496_v26, %v3495_v16 }
0x1648   :  { %3926 = vmatmul.mubr.msk.f32.vlgmr.msra.gmra.mrb[20].mxu0 %vm385_vm4, %v2845_v35 }
0x1649   :  { %3929 = vmatpush3.msra.mxu0 %v3482_v29 }
0x164a   :  { %4151 = vmatprep.subr.bf16.mxu0 %v4150_v20 }
0x171b   :  { %v3927_v59 = vpop.f32.mrb[20].mxu0 }
0x171c   :  { %v2925_v23 = vpop.f32.mrb[21].mxu0 }
0x171d   :  { %3930 = vmatprep.mubr.msk.f32.mxu0 %vm299_vm1, %v2925_v23 }
0x171e   :  { %3931 = vmatmul.mubr.msk.f32.vlgmr.msra.gmra.mrb[16].mxu0 %vm299_vm1, %v3927_v59 }
0x171f   :  { %4153 = vmatpush3.bf16.msra.mxu0 %v4150_v20 }
0x1720   :  { %4155 = vmatprep.subr.bf16.mxu0 %v4154_v24 }
0x1723   :  { %4157 = vmatpush3.bf16.msra.mxu0 %v4154_v24 }
0x1724   :  { %4159 = vmatprep.subr.bf16.mxu0 %v4158_v10 }
0x1727   :  { %4161 = vmatpush3.bf16.msra.mxu0 %v4158_v10 }
0x1728   :  { %4163 = vmatprep.subr.bf16.mxu0 %v4162_v27 }
0x172b   :  { %4165 = vmatpush3.bf16.msra.mxu0 %v4162_v27 }
0x17f1   :  { %v3932_v9 = vpop.f32.mrb[16].mxu0 }
0x17f2   :  { %v3024_v33 = vadd.f32 %v3932_v9, %v3541_v34  ;;  %v3006_v36 = vpop.f32.mrb[17].mxu0 }
0x17f3   :  { %v3023_v37 = vadd.f32 %v3541_v34, %v3006_v36 }
0x17f4   :  { %v3026_v38 = vadd.f32 %v3024_v33, %v4897_v4 }
0x17f5   :  { %v3025_v39 = vadd.f32 %v3023_v37, %v4893_v1  ;;  %v3484_v1 = vld [vmem:[%s5161_s8 + $0x20] sm:$0xff] }
0x17f6   :  { %v3030_v40 = vsel %vm1442_vm8, %v3026_v38, 0.0  ;;  %v4142_v49 = vpack.c.bf16 %v3485_v48, %v3484_v1 }
0x17f7   :  { %3031 = vadd.xlane.f32.xlu1 %v3030_v40  ;;  %v3027_v12 = vsel %vm209_vm0, %v3025_v39, 0.0 }
0x17f8   :  { %3028 = vadd.xlane.f32.xlu0 %v3027_v12  ;;  %4143 = vmatprep.subr.bf16.mxu1 %v4142_v49 }
0x17f9   :  { %4145 = vmatpush3.bf16.msra.mxu1 %v4142_v49 }
0x17fa   :  { %4147 = vmatprep.subr.bf16.mxu1 %v4146_v52 }
0x17fd   :  { %4149 = vmatpush3.bf16.msra.mxu1 %v4146_v52 }
0x1884   :  { %v3032_v41 = vpop.xlane.xlu1 %3031 }
0x1885   :  { %v3034_v42 = vmul.f32 0.03125, %v3032_v41  ;;  %v3029_v43 = vpop.xlane.xlu0 %3028 }
0x1886   :  { %v3033_v44 = vmul.f32 0.03125, %v3029_v43 }
0x1887   :  { %v3036_v45 = vsub.f32 %v3026_v38, %v3034_v42 }
0x1888   :  { %v3035_v19 = vsub.f32 %v3025_v39, %v3033_v44 }
0x1889   :  { %v3038_v47 = vmul.f32 %v3036_v45, %v3036_v45 }
0x188a   :  { %v3037_v21 = vmul.f32 %v3035_v19, %v3035_v19 }
0x188b   :  { %v3042_v4 = vsel %vm1442_vm8, %v3038_v47, 0.0 }
0x188c   :  { %v3039_v46 = vsel %vm209_vm0, %v3037_v21, 0.0 }
0x188d   :  { %3040 = vadd.xlane.f32.xlu0 %v3039_v46 }
0x1891   :  { %3043 = vadd.xlane.f32.xlu0 %v3042_v4 }
0x191a   :  { %v3041_v53 = vpop.xlane.xlu0 %3040 }
0x191b   :  { %v3045_v54 = vmul.f32 0.03125, %v3041_v53 }
0x191d   :  { %v3047_v63 = vadd.f32 1e-05, %v3045_v54 }
0x191e   :  { %v3044_v57 = vpop.xlane.xlu0 %3043 }
0x191f   :  { %4360 = vrsqrt.f32 %v3047_v63  ;;  %v3046_v60 = vmul.f32 0.03125, %v3044_v57 }
0x1921   :  { %v3048_v62 = vadd.f32 1e-05, %v3046_v60 }
0x1923   :  { %4362 = vrsqrt.f32 %v3048_v62 }
0x1929   :  { %v4361_v0 = vpop.eup %4360 }
0x192a   :  { %v3051_v61 = vmul.f32 %v4361_v0, %v3035_v19 }
0x192c   :  { %v3059_v56 = vmul.f32 %v3542_v2, %v3051_v61 }
0x192d   :  { %v4363_v6 = vpop.eup %4362 }
0x192e   :  { %v3052_v7 = vmul.f32 %v4363_v6, %v3036_v45  ;;  %v5079_v8 = vadd.f32 %v3543_v5, %v3059_v56 }
0x1930   :  { %v3060_v11 = vmul.f32 %v3542_v2, %v3052_v7  ;;  %3941 = vmatprep.mubr.msk.f32.mxu1 %vm209_vm0, %v5079_v8 }
0x1932   :  { %v3068_v13 = vadd.f32 %v3543_v5, %v3060_v11 }
0x1934   :  { %3942 = vmatmul.mubr.msk.f32.vlgmr.msra.gmra.mrb[26].mxu1 %vm209_vm0, %v3068_v13 }
0x1a07   :  { %v3943_v18 = vpop.f32.mrb[26].mxu1 }
0x1a08   :  { %v3153_v29 = vadd.f32 %v3943_v18, %v3544_v28  ;;  %v3147_v14 = vpop.f32.mrb[27].mxu1 }
0x1a09   :  { %v3148_v17 = vadd.f32 %v3544_v28, %v3147_v14  ;;  %v3324_v14 = vld [vmem:[%s5169_s16] sm:$0xff] }
0x1a0a   :  { %v3159_v30 = vmul.f32 0.70710677, %v3153_v29  ;;  %v3157_v15 = vmul.f32 0.5, %v3153_v29 }
0x1a0b   :  { %v3158_v31 = vmul.f32 0.70710677, %v3148_v17  ;;  %v3156_v13 = vmul.f32 0.5, %v3148_v17  ;;  %v3325_v17 = vld [vmem:[%s5169_s16 + $0x8] sm:$0xff] }
0x1a0c   :  { %v3161_v32 = vand.u32 2147483647, %v3159_v30  ;;  %vm3201_vm12 = vcmp.ge.f32.partialorder %v3159_v30, 0.0  ;;  %v4167_v30 = vpack.c.bf16 %v3325_v17, %v3324_v14 }
0x1a0d   :  { %v3160_v35 = vand.u32 2147483647, %v3158_v31  ;;  %vm3200_vm13 = vcmp.ge.f32.partialorder %v3158_v31, 0.0  ;;  %v3326_v31 = vld [vmem:[%s5169_s16 + $0x10] sm:$0xff] }
0x1a0e   :  { %v3163_v59 = vmul.f32 0.3275911, %v3161_v32  ;;  %v3189_v33 = vsub.f32 0.0, %v3161_v32 }
0x1a0f   :  { %v3162_v23 = vmul.f32 0.3275911, %v3160_v35  ;;  %v3188_v36 = vsub.f32 0.0, %v3160_v35 }
0x1a10   :  { %v3165_v34 = vadd.f32 1.0, %v3163_v59  ;;  %v3191_v38 = vmul.f32 %v3189_v33, %v3161_v32  ;;  %v3327_v32 = vld [vmem:[%s5169_s16 + $0x18] sm:$0xff]  ;;  %v4414_v59 = vmov 0.0  }
0x1a11   :  { %v3164_v9 = vadd.f32 1.0, %v3162_v23  ;;  %v3190_v12 = vmul.f32 %v3188_v36, %v3160_v35  ;;  %v4170_v35 = vpack.c.bf16 %v3327_v32, %v3326_v31  ;;  %3971 = vmatprep.mubr.msk.f32.mxu1 %vm4413_vm14, %v4414_v59  ;;  %v3550_v36 = vld [vmem:[%s5167_s14 + $0x1] ss:$0 sm:$0xff]  ;;  %s4376_s14 = scalar_lea.vmem %s3417_s22, 32 }
0x1a12   :  { %4364 = vrcp.f32 %v3165_v34  ;;  %v3194_v43 = vmul.f32 1.442695, %v3191_v38  ;;  %v3551_v38 = vld [vmem:[%s5168_s15 + $0x1] ss:$0 sm:$0xff]  ;;  %p4377_p0 = scmp.ne.s32.totalorder %s3417_s22, %s4376_s14  ;;  %p4382_p2 = scmp.lt.s32.totalorder %s4376_s14, %s4376_s14 }
0x1a13   :  { %4366 = vrcp.f32 %v3164_v9  ;;  %v3192_v19 = vmul.f32 1.442695, %v3190_v12  ;;  %v3552_v12 = vld [vmem:[%s5170_s17] ss:$0 sm:$0xff] }
0x1a14   :  { %4368 = vpow2.f32 %v3194_v43  ;;  %p4383_p3 = por %p4382_p2, %p4381_p1 }
0x1a15   :  { %4370 = vpow2.f32 %v3192_v19 }
0x1a16   :  { %p4384_p4 = pnand %p4383_p3, %p4377_p0 }
0x1a1c   :  { %v4365_v37 = vpop.eup %4364 }
0x1a1d   :  { %v4367_v39 = vpop.eup %4366  ;;  %v3171_v40 = vmul.f32 1.0614054, %v4365_v37 }
0x1a1e   :  { %v3170_v41 = vmul.f32 1.0614054, %v4367_v39  ;;  %v4369_v63 = vpop.eup %4368 }
0x1a1f   :  { %v3173_v42 = vadd.f32 -1.4531521, %v3171_v40  ;;  %v4371_v60 = vpop.eup %4370 }
0x1a20   :  { %v3172_v44 = vadd.f32 -1.4531521, %v3170_v41 }
0x1a21   :  { %v3175_v45 = vmul.f32 %v4365_v37, %v3173_v42 }
0x1a22   :  { %v3174_v21 = vmul.f32 %v4367_v39, %v3172_v44 }
0x1a23   :  { %v3177_v46 = vadd.f32 1.4214138, %v3175_v45 }
0x1a24   :  { %v3176_v47 = vadd.f32 1.4214138, %v3174_v21 }
0x1a25   :  { %v3179_v4 = vmul.f32 %v4365_v37, %v3177_v46 }
0x1a26   :  { %v3178_v1 = vmul.f32 %v4367_v39, %v3176_v47 }
0x1a27   :  { %v3181_v48 = vadd.f32 -0.28449672, %v3179_v4 }
0x1a28   :  { %v3180_v49 = vadd.f32 -0.28449672, %v3178_v1 }
0x1a29   :  { %v3183_v50 = vmul.f32 %v4365_v37, %v3181_v48 }
0x1a2a   :  { %v3182_v51 = vmul.f32 %v4367_v39, %v3180_v49 }
0x1a2b   :  { %v3185_v52 = vadd.f32 0.2548296, %v3183_v50 }
0x1a2c   :  { %v3184_v53 = vadd.f32 0.2548296, %v3182_v51 }
0x1a2d   :  { %v3187_v54 = vmul.f32 %v4365_v37, %v3185_v52 }
0x1a2e   :  { %v3186_v57 = vmul.f32 %v4367_v39, %v3184_v53 }
0x1a2f   :  { %v3197_v62 = vmul.f32 %v4369_v63, %v3187_v54 }
0x1a30   :  { %v3196_v0 = vmul.f32 %v4371_v60, %v3186_v57 }
0x1a31   :  { %v3199_v2 = vsub.f32 1.0, %v3197_v62 }
0x1a32   :  { %v3198_v61 = vsub.f32 1.0, %v3196_v0 }
0x1a33   :  { %v3203_v5 = vsub.f32 0.0, %v3199_v2 }
0x1a34   :  { %v3202_v56 = vsub.f32 0.0, %v3198_v61 }
0x1a35   :  { %v3205_v6 = vsel %vm3201_vm12, %v3199_v2, %v3203_v5 }
0x1a36   :  { %v3207_v7 = vadd.f32 1.0, %v3205_v6  ;;  %v3204_v11 = vsel %vm3200_vm13, %v3198_v61, %v3202_v56 }
0x1a37   :  { %v3206_v3 = vadd.f32 1.0, %v3204_v11 }
0x1a38   :  { %v3209_v22 = vmul.f32 %v3207_v7, %v3157_v15 }
0x1a39   :  { %v3208_v20 = vmul.f32 %v3206_v3, %v3156_v13 }
0x1a3b   :  { %3960 = vmatprep.mubr.msk.f32.mxu0 %vm1630_vm11, %v3208_v20 }
0x1a3c   :  { %3961 = vmatmul.mubr.msk.f32.vlgmr.msra.gmra.mrb[22].mxu0 %vm1630_vm11, %v3209_v22 }
0x1b0f   :  { %v3962_v24 = vpop.f32.mrb[22].mxu0 }
0x1b10   :  { %v3288_v55 = vpop.f32.mrb[23].mxu0 }
0x1b11   :  { %v3289_v25 = vadd.f32 %v3547_v58, %v3288_v55 }
0x1b13   :  { %v3296_v10 = vadd.f32 %v3289_v25, %v5079_v8  ;;  %v4412_v8 = vmov 0.0|0.0  }
0x1b14   :  { %4166 = vmatprep.subr.bf16.mxu1 %v4412_v8 }
0x1b15   :  { %v3297_v16 = vsel %vm209_vm0, %v3296_v10, 0.0  ;;  %4168 = vmatpush3.bf16.msra.mxu1 %v4167_v30 }
0x1b16   :  { %3298 = vadd.xlane.f32.xlu0 %v3297_v16  ;;  %4169 = vmatprep.subr.bf16.mxu1 %v4412_v8 }
0x1b19   :  { %4171 = vmatpush3.bf16.msra.mxu1 %v4170_v35 }
0x1ba3   :  { %v3299_v26 = vpop.xlane.xlu0 %3298 }
0x1ba4   :  { %v3300_v27 = vmul.f32 0.03125, %v3299_v26 }
0x1ba6   :  { %v3301_v28 = vsub.f32 %v3296_v10, %v3300_v27 }
0x1ba8   :  { %v3302_v18 = vmul.f32 %v3301_v28, %v3301_v28 }
0x1baa   :  { %v3303_v29 = vsel %vm209_vm0, %v3302_v18, 0.0 }
0x1bab   :  { %3304 = vadd.xlane.f32.xlu0 %v3303_v29 }
0x1c38   :  { %v3305_v23 = vpop.xlane.xlu0 %3304 }
0x1c39   :  { %v3306_v34 = vmul.f32 0.03125, %v3305_v23 }
0x1c3b   :  { %v3307_v9 = vadd.f32 1e-05, %v3306_v34 }
0x1c3d   :  { %4372 = vrsqrt.f32 %v3307_v9 }
0x1c47   :  { %v4373_v33 = vpop.eup %4372 }
0x1c48   :  { %v3309_v37 = vmul.f32 %v4373_v33, %v3301_v28 }
0x1c4a   :  { %v3316_v39 = vmul.f32 %v3550_v36, %v3309_v37 }
0x1c4c   :  { %v3323_v40 = vadd.f32 %v3551_v38, %v3316_v39 }
0x1c4e   :  { %3972 = vmatmul.mubr.msk.f32.vlgmr.msra.gmra.mrb[28].mxu1 %vm209_vm0, %v3323_v40 }
0x1d21   :  { %v3404_v41 = vpop.f32.mrb[28].mxu1 }
0x1d22   :  { %v3405_v42 = vadd.f32 %v3552_v12, %v3404_v41  ;;  %v3973_v43 = vpop.f32.mrb[29].mxu1 }
0x1d24   :  { %3409 = vst.msk [vmem:[#allocation2] sm:$0x3] %vm3408_vm15, %v3405_v42 }
0x1d25   :  { %4387 = shalt.err (!%p4384_p4)
}
0x1d26   :  { %s4388_s4 = scalar_lea.hbm %s5171_s18, 32 }
0x1d27   :  { %p4389_p5 = scmp.ne.s32.totalorder %s5171_s18, %s4388_s4  ;;  %p4392_p6 = scmp.lt.u32.totalorder %s4388_s4, %s5171_s18 }
0x1d29   :  { %p4394_p7 = pnand %p4392_p6, %p4389_p5 }
0x1d2b   :  { %4397 = shalt.err (!%p4394_p7)
}
0x1d2c   :  { %3419 = dma.vmem_to_hbm [thread:$0]  %s3417_s22, 32, %s5171_s18, [#allocation3]  }
0x1d2d   :  { %4398 = dma.done.wait [#allocation3], 32  }
0x1d2e   :  { %4399 = vsyncadd [#allocation3], 4294967264 }
0x1d2f   :  { %3423 = vsyncpa [#allocation3], 1 }

</bundles_post_ra>
